<compile_context>
chip_gen: v7x
topology: tpu7x:2x2x1
jax: 0.10.0
libtpu: 0.0.40
codegen_flags: <defaults>
</compile_context>

<pallas_src>
import functools

import jax
import jax.numpy as jnp
from jax.experimental import pallas as pl
from jax.experimental.pallas import tpu as pltpu


def _inter_mha_kernel(x_ref, clin_ref, wq_ref, bq_ref, wk_ref, bk_ref,
                      wv_ref, bv_ref, wp_ref, bp_ref, o_ref, *,
                      num_heads, windows, n_tokens, m_tokens):
    C = x_ref.shape[-1]
    hd = C // num_heads

    x = x_ref[...]        # (Bt*N, C)
    clin = clin_ref[...]  # (Bt*M, C)

    # Projections (qk scale already folded into wq/bq by the wrapper); f32 accumulation.
    q = jnp.dot(x, wq_ref[...], preferred_element_type=jnp.float32) + bq_ref[...]
    k = jnp.dot(clin, wk_ref[...], preferred_element_type=jnp.float32) + bk_ref[...]
    v = jnp.dot(clin, wv_ref[...], preferred_element_type=jnp.float32) + bv_ref[...]

    q = q.reshape(windows, n_tokens, C)   # cheap leading-dim split
    k = k.reshape(windows, m_tokens, C)
    v = v.reshape(windows, m_tokens, C)

    acc = jnp.zeros((windows * n_tokens, C), dtype=jnp.float32)
    for h in range(num_heads):            # static, small head count -> unrolled
        lo = h * hd
        qh = q[:, :, lo:lo + hd]          # (Bt, N, hd)
        kh = k[:, :, lo:lo + hd]          # (Bt, M, hd)
        vh = v[:, :, lo:lo + hd]          # (Bt, M, hd)

        s = jnp.einsum('bnd,bmd->bnm', qh, kh,
                       preferred_element_type=jnp.float32)        # (Bt, N, M)
        s = s - jnp.max(s, axis=-1, keepdims=True)
        p = jnp.exp(s)
        p = p * pl.reciprocal(jnp.sum(p, axis=-1, keepdims=True), approx=True)
        oh = jnp.einsum('bnm,bmd->bnd', p, vh,
                        preferred_element_type=jnp.float32)       # (Bt, N, hd)
        # Head-merge + output projection without a lane-axis concatenate:
        #   concat_h(oh) @ Wp.T == sum_h oh @ Wp.T[h*hd:(h+1)*hd, :]
        acc = acc + jnp.dot(oh.reshape(windows * n_tokens, hd), wp_ref[h],
                            preferred_element_type=jnp.float32)

    out = acc + bp_ref[...]
    o_ref[...] = out.astype(o_ref.dtype)


def _pick_block_windows(b, n, m, cap):
    """Largest divisor of b that is <= cap and keeps block sublane dims 8-aligned."""
    best = None
    for d in range(1, b + 1):
        if b % d:
            continue
        if d > cap:
            break
        if (d * n) % 8 == 0 and (d * m) % 8 == 0:
            best = d
    if best is None:
        best = b  # full-array blocks are always legal
    return best


def inter_multi_head_attention(x, clinical, params, num_heads, *,
                               max_windows_per_block=32):
    """x: (B_, N, C), clinical: (B_, M, C). Returns (B_, N, C). mask=None path only."""
    B_, N, C = x.shape
    M = clinical.shape[1]
    hd = C // num_heads
    scale = hd ** (-0.5)

    # ---- trace-time weight preparation (free) -----------------------------
    wq_t = params["wq"].T * scale                      # (C, C), scale folded in
    bq_s = params["bq"] * scale                        # (1, C)
    wk_t = params["wkv"][:C].T                         # (C, C)
    wv_t = params["wkv"][C:].T                         # (C, C)
    bk = params["bkv"][:, :C]                          # (1, C)
    bv = params["bkv"][:, C:]                          # (1, C)
    wp_h = params["wp"].T.reshape(num_heads, hd, C)    # per-head rows of Wp.T
    bp = params["bp"]                                  # (1, C)

    # ---- choose windows-per-block and flatten sequence dims ---------------
    bt = _pick_block_windows(B_, N, M, max_windows_per_block)
    grid = (B_ // bt,)
    x2 = x.reshape(B_ * N, C)
    c2 = clinical.reshape(B_ * M, C)

    kernel = functools.partial(_inter_mha_kernel, num_heads=num_heads,
                               windows=bt, n_tokens=N, m_tokens=M)

    full2 = lambda b: (0, 0)
    full3 = lambda b: (0, 0, 0)

    def _nbytes(a):
        return a.size * a.dtype.itemsize

    cost = pl.CostEstimate(
        flops=2 * B_ * (N * C * C + 2 * M * C * C + 2 * N * M * C + N * C * C),
        transcendentals=B_ * num_heads * N * M,
        bytes_accessed=(2 * _nbytes(x) + _nbytes(clinical)
                        + sum(_nbytes(w) for w in
                              (wq_t, bq_s, wk_t, bk, wv_t, bv, wp_h, bp))),
    )

    out2 = pl.pallas_call(
        kernel,
        out_shape=jax.ShapeDtypeStruct((B_ * N, C), x.dtype),
        grid_spec=pltpu.PrefetchScalarGridSpec(
            num_scalar_prefetch=0,
            grid=grid,
            in_specs=[
                pl.BlockSpec((bt * N, C), lambda b: (b, 0)),    # x rows
                pl.BlockSpec((bt * M, C), lambda b: (b, 0)),    # clinical rows
                pl.BlockSpec((C, C), full2),                    # Wq.T * scale
                pl.BlockSpec((1, C), full2),                    # bq * scale
                pl.BlockSpec((C, C), full2),                    # Wk.T
                pl.BlockSpec((1, C), full2),                    # bk
                pl.BlockSpec((C, C), full2),                    # Wv.T
                pl.BlockSpec((1, C), full2),                    # bv
                pl.BlockSpec((num_heads, hd, C), full3),        # Wp.T split per head
                pl.BlockSpec((1, C), full2),                    # bp
            ],
            out_specs=pl.BlockSpec((bt * N, C), lambda b: (b, 0)),
        ),
        compiler_params=pltpu.CompilerParams(
            dimension_semantics=("parallel",)),
        cost_estimate=cost,
    )(x2, c2, wq_t, bq_s, wk_t, bk, wv_t, bv, wp_h, bp)

    return out2.reshape(B_, N, C)


def _reference(x, clinical, params, num_heads):
    """Pure-JAX reference mirroring the PyTorch forward (mask=None, dropout=0)."""
    B_, N, C = x.shape
    M = clinical.shape[1]
    hd = C // num_heads
    scale = hd ** (-0.5)
    kv = clinical @ params["wkv"].T + params["bkv"][0]            # (B, M, 2C)
    kv = kv.reshape(B_, M, 2, num_heads, hd).transpose(2, 0, 3, 1, 4)
    k, v = kv[0], kv[1]                                           # (B, H, M, hd)
    q = (x @ params["wq"].T + params["bq"][0]).reshape(B_, N, num_heads, hd)
    q = q.transpose(0, 2, 1, 3) * scale                           # (B, H, N, hd)
    attn = q @ jnp.swapaxes(k, -2, -1)                            # (B, H, N, M)
    attn = jax.nn.softmax(attn, axis=-1)
    out = (attn @ v).transpose(0, 2, 1, 3).reshape(B_, N, C)
    return out @ params["wp"].T + params["bp"][0]


if __name__ == "__main__":
    # Small shapes consistent with the module's forward (num_windows*B, N, dim).
    B_, N, C = 16, 8, 32
    M = 16                       # num_features (clinical sequence length)
    num_heads = 4                # dim // num_heads = 8

    key = jax.random.PRNGKey(0)
    ks = jax.random.split(key, 8)
    s = 0.05
    params = {
        "wq":  jax.random.normal(ks[0], (C, C), jnp.float32) * s,
        "bq":  jax.random.normal(ks[1], (1, C), jnp.float32) * s,
        "wkv": jax.random.normal(ks[2], (2 * C, C), jnp.float32) * s,
        "bkv": jax.random.normal(ks[3], (1, 2 * C), jnp.float32) * s,
        "wp":  jax.random.normal(ks[4], (C, C), jnp.float32) * s,
        "bp":  jax.random.normal(ks[5], (1, C), jnp.float32) * s,
    }
    x = jax.random.normal(ks[6], (B_, N, C), jnp.float32)
    clinical = jax.random.normal(ks[7], (B_, M, C), jnp.float32)

    # max_windows_per_block=8 -> 8 windows per grid step, grid=(2,)
    out = inter_multi_head_attention(x, clinical, params, num_heads,
                                     max_windows_per_block=8)
    out = jax.block_until_ready(out)

    ref = _reference(x, clinical, params, num_heads)
    assert out.shape == (B_, N, C)
    # approx reciprocal in the softmax denominator -> slightly looser tolerance
    assert jnp.allclose(out, ref, atol=1e-3, rtol=1e-3), "mismatch vs reference"
    print("KERNEL_OK")
</pallas_src>

<mosaic_0001>
module attributes {stable_mosaic.version = 11 : i64} {
  func.func @_inter_mha_kernel(%arg0: i32, %arg1: memref<64x32xf32, #tpu.memory_space<vmem>>, %arg2: memref<128x32xf32, #tpu.memory_space<vmem>>, %arg3: memref<32x32xf32, #tpu.memory_space<vmem>>, %arg4: memref<1x32xf32, #tpu.memory_space<vmem>>, %arg5: memref<32x32xf32, #tpu.memory_space<vmem>>, %arg6: memref<1x32xf32, #tpu.memory_space<vmem>>, %arg7: memref<32x32xf32, #tpu.memory_space<vmem>>, %arg8: memref<1x32xf32, #tpu.memory_space<vmem>>, %arg9: memref<4x8x32xf32, #tpu.memory_space<vmem>>, %arg10: memref<1x32xf32, #tpu.memory_space<vmem>>, %arg11: memref<64x32xf32, #tpu.memory_space<vmem>>) attributes {dimension_semantics = [#tpu.dimension_semantics<parallel>], iteration_bounds = array<i64: 2>, scalar_prefetch = 0 : i64, scratch_operands = 0 : i64, tpu.core_type = #tpu.core_type<tc>, window_params = [{transform_indices = @transform_0, window_bounds = array<i64: 64, 32>}, {transform_indices = @transform_1, window_bounds = array<i64: 128, 32>}, {pipeline_mode = #tpu.pipeline_mode<synchronous>, transform_indices = @transform_2, window_bounds = array<i64: 32, 32>}, {pipeline_mode = #tpu.pipeline_mode<synchronous>, transform_indices = @transform_3, window_bounds = array<i64: 1, 32>}, {pipeline_mode = #tpu.pipeline_mode<synchronous>, transform_indices = @transform_4, window_bounds = array<i64: 32, 32>}, {pipeline_mode = #tpu.pipeline_mode<synchronous>, transform_indices = @transform_5, window_bounds = array<i64: 1, 32>}, {pipeline_mode = #tpu.pipeline_mode<synchronous>, transform_indices = @transform_6, window_bounds = array<i64: 32, 32>}, {pipeline_mode = #tpu.pipeline_mode<synchronous>, transform_indices = @transform_7, window_bounds = array<i64: 1, 32>}, {pipeline_mode = #tpu.pipeline_mode<synchronous>, transform_indices = @transform_8, window_bounds = array<i64: 4, 8, 32>}, {pipeline_mode = #tpu.pipeline_mode<synchronous>, transform_indices = @transform_9, window_bounds = array<i64: 1, 32>}, {transform_indices = @transform_10, window_bounds = array<i64: 64, 32>}]} {
    %c0 = arith.constant 0 : index
    %c0_0 = arith.constant 0 : index
    %0 = vector.load %arg1[%c0, %c0_0] : memref<64x32xf32, #tpu.memory_space<vmem>>, vector<64x32xf32>
    %c0_1 = arith.constant 0 : index
    %c0_2 = arith.constant 0 : index
    %1 = vector.load %arg2[%c0_1, %c0_2] : memref<128x32xf32, #tpu.memory_space<vmem>>, vector<128x32xf32>
    %c0_3 = arith.constant 0 : index
    %c0_4 = arith.constant 0 : index
    %2 = vector.load %arg3[%c0_3, %c0_4] : memref<32x32xf32, #tpu.memory_space<vmem>>, vector<32x32xf32>
    %cst = arith.constant dense<0.000000e+00> : vector<64x32xf32>
    %3 = tpu.matmul %0, %2, %cst {dimension_numbers = #tpu.dot_dimension_numbers<[1], [0], [0], [1], [0, 0, 1, 1], [], []>} : vector<64x32xf32>, vector<32x32xf32>, vector<64x32xf32> -> vector<64x32xf32>
    %c0_5 = arith.constant 0 : index
    %c0_6 = arith.constant 0 : index
    %4 = vector.load %arg4[%c0_5, %c0_6] : memref<1x32xf32, #tpu.memory_space<vmem>>, vector<1x32xf32>
    %5 = vector.broadcast %4 : vector<1x32xf32> to vector<64x32xf32>
    %6 = arith.addf %3, %5 : vector<64x32xf32>
    %c0_7 = arith.constant 0 : index
    %c0_8 = arith.constant 0 : index
    %7 = vector.load %arg5[%c0_7, %c0_8] : memref<32x32xf32, #tpu.memory_space<vmem>>, vector<32x32xf32>
    %cst_9 = arith.constant dense<0.000000e+00> : vector<128x32xf32>
    %8 = tpu.matmul %1, %7, %cst_9 {dimension_numbers = #tpu.dot_dimension_numbers<[1], [0], [0], [1], [0, 0, 1, 1], [], []>} : vector<128x32xf32>, vector<32x32xf32>, vector<128x32xf32> -> vector<128x32xf32>
    %c0_10 = arith.constant 0 : index
    %c0_11 = arith.constant 0 : index
    %9 = vector.load %arg6[%c0_10, %c0_11] : memref<1x32xf32, #tpu.memory_space<vmem>>, vector<1x32xf32>
    %10 = vector.broadcast %9 : vector<1x32xf32> to vector<128x32xf32>
    %11 = arith.addf %8, %10 : vector<128x32xf32>
    %c0_12 = arith.constant 0 : index
    %c0_13 = arith.constant 0 : index
    %12 = vector.load %arg7[%c0_12, %c0_13] : memref<32x32xf32, #tpu.memory_space<vmem>>, vector<32x32xf32>
    %cst_14 = arith.constant dense<0.000000e+00> : vector<128x32xf32>
    %13 = tpu.matmul %1, %12, %cst_14 {dimension_numbers = #tpu.dot_dimension_numbers<[1], [0], [0], [1], [0, 0, 1, 1], [], []>} : vector<128x32xf32>, vector<32x32xf32>, vector<128x32xf32> -> vector<128x32xf32>
    %c0_15 = arith.constant 0 : index
    %c0_16 = arith.constant 0 : index
    %14 = vector.load %arg8[%c0_15, %c0_16] : memref<1x32xf32, #tpu.memory_space<vmem>>, vector<1x32xf32>
    %15 = vector.broadcast %14 : vector<1x32xf32> to vector<128x32xf32>
    %16 = arith.addf %13, %15 : vector<128x32xf32>
    %17 = vector.shape_cast %6 : vector<64x32xf32> to vector<8x8x32xf32>
    %18 = vector.shape_cast %11 : vector<128x32xf32> to vector<8x16x32xf32>
    %19 = vector.shape_cast %16 : vector<128x32xf32> to vector<8x16x32xf32>
    %cst_17 = arith.constant 0.000000e+00 : f32
    %20 = vector.broadcast %cst_17 : f32 to vector<64x32xf32>
    %21 = vector.extract_strided_slice %17 {offsets = [0, 0, 0], sizes = [8, 8, 8], strides = [1, 1, 1]} : vector<8x8x32xf32> to vector<8x8x8xf32>
    %22 = vector.extract_strided_slice %18 {offsets = [0, 0, 0], sizes = [8, 16, 8], strides = [1, 1, 1]} : vector<8x16x32xf32> to vector<8x16x8xf32>
    %23 = vector.extract_strided_slice %19 {offsets = [0, 0, 0], sizes = [8, 16, 8], strides = [1, 1, 1]} : vector<8x16x32xf32> to vector<8x16x8xf32>
    "tpu.trace_start"() <{level = 10 : i32, message = "bnd,bmd->bnm"}> : () -> ()
    %cst_18 = arith.constant dense<0.000000e+00> : vector<8x8x16xf32>
    %24 = tpu.matmul %21, %22, %cst_18 {dimension_numbers = #tpu.dot_dimension_numbers<[2], [2], [1], [1], [0, 0, 0, 1, 1, 1], [0], [0]>} : vector<8x8x8xf32>, vector<8x16x8xf32>, vector<8x8x16xf32> -> vector<8x8x16xf32>
    "tpu.trace_stop"() : () -> ()
    %cst_19 = arith.constant dense<0xFF800000> : vector<8x8xf32>
    %25 = vector.multi_reduction <maximumf>, %24, %cst_19 [2] : vector<8x8x16xf32> to vector<8x8xf32>
    %26 = vector.shape_cast %25 : vector<8x8xf32> to vector<8x8x1xf32>
    %27 = vector.broadcast %26 : vector<8x8x1xf32> to vector<8x8x16xf32>
    %28 = arith.subf %24, %27 : vector<8x8x16xf32>
    %29 = math.exp %28 : vector<8x8x16xf32>
    %cst_20 = arith.constant dense<0.000000e+00> : vector<8x8xf32>
    %30 = vector.multi_reduction <add>, %29, %cst_20 [2] : vector<8x8x16xf32> to vector<8x8xf32>
    %31 = vector.shape_cast %30 : vector<8x8xf32> to vector<8x8x1xf32>
    %32 = tpu.reciprocal %31 {approx = true} : vector<8x8x1xf32> -> vector<8x8x1xf32>
    %33 = vector.broadcast %32 : vector<8x8x1xf32> to vector<8x8x16xf32>
    %34 = arith.mulf %29, %33 : vector<8x8x16xf32>
    "tpu.trace_start"() <{level = 10 : i32, message = "bnm,bmd->bnd"}> : () -> ()
    %cst_21 = arith.constant dense<0.000000e+00> : vector<8x8x8xf32>
    %35 = tpu.matmul %34, %23, %cst_21 {dimension_numbers = #tpu.dot_dimension_numbers<[2], [1], [1], [2], [0, 0, 0, 1, 1, 2], [0], [0]>} : vector<8x8x16xf32>, vector<8x16x8xf32>, vector<8x8x8xf32> -> vector<8x8x8xf32>
    "tpu.trace_stop"() : () -> ()
    %36 = vector.shape_cast %35 : vector<8x8x8xf32> to vector<64x8xf32>
    %c0_22 = arith.constant 0 : index
    %c0_23 = arith.constant 0 : index
    %c0_24 = arith.constant 0 : index
    %37 = vector.load %arg9[%c0_22, %c0_23, %c0_24] : memref<4x8x32xf32, #tpu.memory_space<vmem>>, vector<1x8x32xf32>
    %38 = vector.shape_cast %37 : vector<1x8x32xf32> to vector<8x32xf32>
    %cst_25 = arith.constant dense<0.000000e+00> : vector<64x32xf32>
    %39 = tpu.matmul %36, %38, %cst_25 {dimension_numbers = #tpu.dot_dimension_numbers<[1], [0], [0], [1], [0, 0, 1, 1], [], []>} : vector<64x8xf32>, vector<8x32xf32>, vector<64x32xf32> -> vector<64x32xf32>
    %40 = arith.addf %20, %39 : vector<64x32xf32>
    %41 = vector.extract_strided_slice %17 {offsets = [0, 0, 8], sizes = [8, 8, 8], strides = [1, 1, 1]} : vector<8x8x32xf32> to vector<8x8x8xf32>
    %42 = vector.extract_strided_slice %18 {offsets = [0, 0, 8], sizes = [8, 16, 8], strides = [1, 1, 1]} : vector<8x16x32xf32> to vector<8x16x8xf32>
    %43 = vector.extract_strided_slice %19 {offsets = [0, 0, 8], sizes = [8, 16, 8], strides = [1, 1, 1]} : vector<8x16x32xf32> to vector<8x16x8xf32>
    "tpu.trace_start"() <{level = 10 : i32, message = "bnd,bmd->bnm"}> : () -> ()
    %cst_26 = arith.constant dense<0.000000e+00> : vector<8x8x16xf32>
    %44 = tpu.matmul %41, %42, %cst_26 {dimension_numbers = #tpu.dot_dimension_numbers<[2], [2], [1], [1], [0, 0, 0, 1, 1, 1], [0], [0]>} : vector<8x8x8xf32>, vector<8x16x8xf32>, vector<8x8x16xf32> -> vector<8x8x16xf32>
    "tpu.trace_stop"() : () -> ()
    %cst_27 = arith.constant dense<0xFF800000> : vector<8x8xf32>
    %45 = vector.multi_reduction <maximumf>, %44, %cst_27 [2] : vector<8x8x16xf32> to vector<8x8xf32>
    %46 = vector.shape_cast %45 : vector<8x8xf32> to vector<8x8x1xf32>
    %47 = vector.broadcast %46 : vector<8x8x1xf32> to vector<8x8x16xf32>
    %48 = arith.subf %44, %47 : vector<8x8x16xf32>
    %49 = math.exp %48 : vector<8x8x16xf32>
    %cst_28 = arith.constant dense<0.000000e+00> : vector<8x8xf32>
    %50 = vector.multi_reduction <add>, %49, %cst_28 [2] : vector<8x8x16xf32> to vector<8x8xf32>
    %51 = vector.shape_cast %50 : vector<8x8xf32> to vector<8x8x1xf32>
    %52 = tpu.reciprocal %51 {approx = true} : vector<8x8x1xf32> -> vector<8x8x1xf32>
    %53 = vector.broadcast %52 : vector<8x8x1xf32> to vector<8x8x16xf32>
    %54 = arith.mulf %49, %53 : vector<8x8x16xf32>
    "tpu.trace_start"() <{level = 10 : i32, message = "bnm,bmd->bnd"}> : () -> ()
    %cst_29 = arith.constant dense<0.000000e+00> : vector<8x8x8xf32>
    %55 = tpu.matmul %54, %43, %cst_29 {dimension_numbers = #tpu.dot_dimension_numbers<[2], [1], [1], [2], [0, 0, 0, 1, 1, 2], [0], [0]>} : vector<8x8x16xf32>, vector<8x16x8xf32>, vector<8x8x8xf32> -> vector<8x8x8xf32>
    "tpu.trace_stop"() : () -> ()
    %56 = vector.shape_cast %55 : vector<8x8x8xf32> to vector<64x8xf32>
    %c1 = arith.constant 1 : index
    %c0_30 = arith.constant 0 : index
    %c0_31 = arith.constant 0 : index
    %57 = vector.load %arg9[%c1, %c0_30, %c0_31] : memref<4x8x32xf32, #tpu.memory_space<vmem>>, vector<1x8x32xf32>
    %58 = vector.shape_cast %57 : vector<1x8x32xf32> to vector<8x32xf32>
    %cst_32 = arith.constant dense<0.000000e+00> : vector<64x32xf32>
    %59 = tpu.matmul %56, %58, %cst_32 {dimension_numbers = #tpu.dot_dimension_numbers<[1], [0], [0], [1], [0, 0, 1, 1], [], []>} : vector<64x8xf32>, vector<8x32xf32>, vector<64x32xf32> -> vector<64x32xf32>
    %60 = arith.addf %40, %59 : vector<64x32xf32>
    %61 = vector.extract_strided_slice %17 {offsets = [0, 0, 16], sizes = [8, 8, 8], strides = [1, 1, 1]} : vector<8x8x32xf32> to vector<8x8x8xf32>
    %62 = vector.extract_strided_slice %18 {offsets = [0, 0, 16], sizes = [8, 16, 8], strides = [1, 1, 1]} : vector<8x16x32xf32> to vector<8x16x8xf32>
    %63 = vector.extract_strided_slice %19 {offsets = [0, 0, 16], sizes = [8, 16, 8], strides = [1, 1, 1]} : vector<8x16x32xf32> to vector<8x16x8xf32>
    "tpu.trace_start"() <{level = 10 : i32, message = "bnd,bmd->bnm"}> : () -> ()
    %cst_33 = arith.constant dense<0.000000e+00> : vector<8x8x16xf32>
    %64 = tpu.matmul %61, %62, %cst_33 {dimension_numbers = #tpu.dot_dimension_numbers<[2], [2], [1], [1], [0, 0, 0, 1, 1, 1], [0], [0]>} : vector<8x8x8xf32>, vector<8x16x8xf32>, vector<8x8x16xf32> -> vector<8x8x16xf32>
    "tpu.trace_stop"() : () -> ()
    %cst_34 = arith.constant dense<0xFF800000> : vector<8x8xf32>
    %65 = vector.multi_reduction <maximumf>, %64, %cst_34 [2] : vector<8x8x16xf32> to vector<8x8xf32>
    %66 = vector.shape_cast %65 : vector<8x8xf32> to vector<8x8x1xf32>
    %67 = vector.broadcast %66 : vector<8x8x1xf32> to vector<8x8x16xf32>
    %68 = arith.subf %64, %67 : vector<8x8x16xf32>
    %69 = math.exp %68 : vector<8x8x16xf32>
    %cst_35 = arith.constant dense<0.000000e+00> : vector<8x8xf32>
    %70 = vector.multi_reduction <add>, %69, %cst_35 [2] : vector<8x8x16xf32> to vector<8x8xf32>
    %71 = vector.shape_cast %70 : vector<8x8xf32> to vector<8x8x1xf32>
    %72 = tpu.reciprocal %71 {approx = true} : vector<8x8x1xf32> -> vector<8x8x1xf32>
    %73 = vector.broadcast %72 : vector<8x8x1xf32> to vector<8x8x16xf32>
    %74 = arith.mulf %69, %73 : vector<8x8x16xf32>
    "tpu.trace_start"() <{level = 10 : i32, message = "bnm,bmd->bnd"}> : () -> ()
    %cst_36 = arith.constant dense<0.000000e+00> : vector<8x8x8xf32>
    %75 = tpu.matmul %74, %63, %cst_36 {dimension_numbers = #tpu.dot_dimension_numbers<[2], [1], [1], [2], [0, 0, 0, 1, 1, 2], [0], [0]>} : vector<8x8x16xf32>, vector<8x16x8xf32>, vector<8x8x8xf32> -> vector<8x8x8xf32>
    "tpu.trace_stop"() : () -> ()
    %76 = vector.shape_cast %75 : vector<8x8x8xf32> to vector<64x8xf32>
    %c2 = arith.constant 2 : index
    %c0_37 = arith.constant 0 : index
    %c0_38 = arith.constant 0 : index
    %77 = vector.load %arg9[%c2, %c0_37, %c0_38] : memref<4x8x32xf32, #tpu.memory_space<vmem>>, vector<1x8x32xf32>
    %78 = vector.shape_cast %77 : vector<1x8x32xf32> to vector<8x32xf32>
    %cst_39 = arith.constant dense<0.000000e+00> : vector<64x32xf32>
    %79 = tpu.matmul %76, %78, %cst_39 {dimension_numbers = #tpu.dot_dimension_numbers<[1], [0], [0], [1], [0, 0, 1, 1], [], []>} : vector<64x8xf32>, vector<8x32xf32>, vector<64x32xf32> -> vector<64x32xf32>
    %80 = arith.addf %60, %79 : vector<64x32xf32>
    %81 = vector.extract_strided_slice %17 {offsets = [0, 0, 24], sizes = [8, 8, 8], strides = [1, 1, 1]} : vector<8x8x32xf32> to vector<8x8x8xf32>
    %82 = vector.extract_strided_slice %18 {offsets = [0, 0, 24], sizes = [8, 16, 8], strides = [1, 1, 1]} : vector<8x16x32xf32> to vector<8x16x8xf32>
    %83 = vector.extract_strided_slice %19 {offsets = [0, 0, 24], sizes = [8, 16, 8], strides = [1, 1, 1]} : vector<8x16x32xf32> to vector<8x16x8xf32>
    "tpu.trace_start"() <{level = 10 : i32, message = "bnd,bmd->bnm"}> : () -> ()
    %cst_40 = arith.constant dense<0.000000e+00> : vector<8x8x16xf32>
    %84 = tpu.matmul %81, %82, %cst_40 {dimension_numbers = #tpu.dot_dimension_numbers<[2], [2], [1], [1], [0, 0, 0, 1, 1, 1], [0], [0]>} : vector<8x8x8xf32>, vector<8x16x8xf32>, vector<8x8x16xf32> -> vector<8x8x16xf32>
    "tpu.trace_stop"() : () -> ()
    %cst_41 = arith.constant dense<0xFF800000> : vector<8x8xf32>
    %85 = vector.multi_reduction <maximumf>, %84, %cst_41 [2] : vector<8x8x16xf32> to vector<8x8xf32>
    %86 = vector.shape_cast %85 : vector<8x8xf32> to vector<8x8x1xf32>
    %87 = vector.broadcast %86 : vector<8x8x1xf32> to vector<8x8x16xf32>
    %88 = arith.subf %84, %87 : vector<8x8x16xf32>
    %89 = math.exp %88 : vector<8x8x16xf32>
    %cst_42 = arith.constant dense<0.000000e+00> : vector<8x8xf32>
    %90 = vector.multi_reduction <add>, %89, %cst_42 [2] : vector<8x8x16xf32> to vector<8x8xf32>
    %91 = vector.shape_cast %90 : vector<8x8xf32> to vector<8x8x1xf32>
    %92 = tpu.reciprocal %91 {approx = true} : vector<8x8x1xf32> -> vector<8x8x1xf32>
    %93 = vector.broadcast %92 : vector<8x8x1xf32> to vector<8x8x16xf32>
    %94 = arith.mulf %89, %93 : vector<8x8x16xf32>
    "tpu.trace_start"() <{level = 10 : i32, message = "bnm,bmd->bnd"}> : () -> ()
    %cst_43 = arith.constant dense<0.000000e+00> : vector<8x8x8xf32>
    %95 = tpu.matmul %94, %83, %cst_43 {dimension_numbers = #tpu.dot_dimension_numbers<[2], [1], [1], [2], [0, 0, 0, 1, 1, 2], [0], [0]>} : vector<8x8x16xf32>, vector<8x16x8xf32>, vector<8x8x8xf32> -> vector<8x8x8xf32>
    "tpu.trace_stop"() : () -> ()
    %96 = vector.shape_cast %95 : vector<8x8x8xf32> to vector<64x8xf32>
    %c3 = arith.constant 3 : index
    %c0_44 = arith.constant 0 : index
    %c0_45 = arith.constant 0 : index
    %97 = vector.load %arg9[%c3, %c0_44, %c0_45] : memref<4x8x32xf32, #tpu.memory_space<vmem>>, vector<1x8x32xf32>
    %98 = vector.shape_cast %97 : vector<1x8x32xf32> to vector<8x32xf32>
    %cst_46 = arith.constant dense<0.000000e+00> : vector<64x32xf32>
    %99 = tpu.matmul %96, %98, %cst_46 {dimension_numbers = #tpu.dot_dimension_numbers<[1], [0], [0], [1], [0, 0, 1, 1], [], []>} : vector<64x8xf32>, vector<8x32xf32>, vector<64x32xf32> -> vector<64x32xf32>
    %100 = arith.addf %80, %99 : vector<64x32xf32>
    %c0_47 = arith.constant 0 : index
    %c0_48 = arith.constant 0 : index
    %101 = vector.load %arg10[%c0_47, %c0_48] : memref<1x32xf32, #tpu.memory_space<vmem>>, vector<1x32xf32>
    %102 = vector.broadcast %101 : vector<1x32xf32> to vector<64x32xf32>
    %103 = arith.addf %100, %102 : vector<64x32xf32>
    %c0_49 = arith.constant 0 : index
    %c0_50 = arith.constant 0 : index
    %104 = vector.load %arg11[%c0_49, %c0_50] : memref<64x32xf32, #tpu.memory_space<vmem>>, vector<64x32xf32>
    tpu.vector_store %arg11[%c0_49, %c0_50], %103 {strides = array<i32>} : memref<64x32xf32, #tpu.memory_space<vmem>>, vector<64x32xf32>,
    return
  }
  func.func @transform_0(%arg0: i32) -> (i32, i32) {
    %c0_i32 = arith.constant 0 : i32
    %c0_i32_0 = arith.constant 0 : i32
    return %arg0, %c0_i32 : i32, i32
  }
  func.func @transform_1(%arg0: i32) -> (i32, i32) {
    %c0_i32 = arith.constant 0 : i32
    %c0_i32_0 = arith.constant 0 : i32
    return %arg0, %c0_i32 : i32, i32
  }
  func.func @transform_2(%arg0: i32) -> (i32, i32) {
    %c0_i32 = arith.constant 0 : i32
    %c0_i32_0 = arith.constant 0 : i32
    %c0_i32_1 = arith.constant 0 : i32
    return %c0_i32, %c0_i32_0 : i32, i32
  }
  func.func @transform_3(%arg0: i32) -> (i32, i32) {
    %c0_i32 = arith.constant 0 : i32
    %c0_i32_0 = arith.constant 0 : i32
    %c0_i32_1 = arith.constant 0 : i32
    return %c0_i32, %c0_i32_0 : i32, i32
  }
  func.func @transform_4(%arg0: i32) -> (i32, i32) {
    %c0_i32 = arith.constant 0 : i32
    %c0_i32_0 = arith.constant 0 : i32
    %c0_i32_1 = arith.constant 0 : i32
    return %c0_i32, %c0_i32_0 : i32, i32
  }
  func.func @transform_5(%arg0: i32) -> (i32, i32) {
    %c0_i32 = arith.constant 0 : i32
    %c0_i32_0 = arith.constant 0 : i32
    %c0_i32_1 = arith.constant 0 : i32
    return %c0_i32, %c0_i32_0 : i32, i32
  }
  func.func @transform_6(%arg0: i32) -> (i32, i32) {
    %c0_i32 = arith.constant 0 : i32
    %c0_i32_0 = arith.constant 0 : i32
    %c0_i32_1 = arith.constant 0 : i32
    return %c0_i32, %c0_i32_0 : i32, i32
  }
  func.func @transform_7(%arg0: i32) -> (i32, i32) {
    %c0_i32 = arith.constant 0 : i32
    %c0_i32_0 = arith.constant 0 : i32
    %c0_i32_1 = arith.constant 0 : i32
    return %c0_i32, %c0_i32_0 : i32, i32
  }
  func.func @transform_8(%arg0: i32) -> (i32, i32, i32) {
    %c0_i32 = arith.constant 0 : i32
    %c0_i32_0 = arith.constant 0 : i32
    %c0_i32_1 = arith.constant 0 : i32
    %c0_i32_2 = arith.constant 0 : i32
    return %c0_i32, %c0_i32_0, %c0_i32_1 : i32, i32, i32
  }
  func.func @transform_9(%arg0: i32) -> (i32, i32) {
    %c0_i32 = arith.constant 0 : i32
    %c0_i32_0 = arith.constant 0 : i32
    %c0_i32_1 = arith.constant 0 : i32
    return %c0_i32, %c0_i32_0 : i32, i32
  }
  func.func @transform_10(%arg0: i32) -> (i32, i32) {
    %c0_i32 = arith.constant 0 : i32
    %c0_i32_0 = arith.constant 0 : i32
    return %arg0, %c0_i32 : i32, i32
  }
}

</mosaic_0001>

<bundles_post_ra>
// kernel: tpu_custom_call.1
= control target key start
LH: loop header
LB: loop body
LE: loop exit
PB: predicated region body
PF: predicated region fallthrough
CT: control target
= control target key end

     0   :  { %s8805_s13 = smov 0   ;;  %s9880_s0 = inlined_call_operand.vmem [shape: f32[128,32], index: 0, kind: input, shape index: {}]   ;;  %s9881_s1 = inlined_call_operand.vmem [shape: f32[256,32], index: 1, kind: input, shape index: {}]   ;;  %s9882_s2 = inlined_call_operand.vmem [shape: f32[32,32], index: 2, kind: input, shape index: {}]   ;;  %s9883_s3 = inlined_call_operand.vmem [shape: f32[1,32], index: 3, kind: input, shape index: {}]   ;;  %s9884_s4 = inlined_call_operand.vmem [shape: f32[32,32], index: 4, kind: input, shape index: {}]   ;;  %s9885_s5 = inlined_call_operand.vmem [shape: f32[1,32], index: 5, kind: input, shape index: {}]   ;;  %s9886_s6 = inlined_call_operand.vmem [shape: f32[32,32], index: 6, kind: input, shape index: {}]   ;;  %s9887_s7 = inlined_call_operand.vmem [shape: f32[1,32], index: 7, kind: input, shape index: {}]   ;;  %s9888_s8 = inlined_call_operand.vmem [shape: f32[4,8,32], index: 8, kind: input, shape index: {}]   ;;  %s9889_s9 = inlined_call_operand.vmem [shape: f32[1,32], index: 9, kind: input, shape index: {}]   ;;  %s9890_s10 = inlined_call_operand.vmem [shape: f32[128,32], index: 10, kind: output, shape index: {}]  }
   0x1 LB: > { %s6990_s14 = sadd.s32 4294967295, %s8742_s13   ;;  %p6994_p0 = scmp.ge.s32.totalorder %s8742_s13, 1  ;;  %s8742_s13 = sphi %s8805_s13, %s20_s13  }
   0x2   : > { %p324_p1 = scmp.lt.s32.totalorder %s8742_s13, 3 }
   0x4   : > { %p325_p2 = pnand %p6994_p0, %p324_p1 }
   0x5   : > { %v409_v0 = vld [vmem:[%s9882_s2] sm:$0xff] (!%p325_p2)  ;;  %v410_v1 = vld [vmem:[%s9882_s2 + $0x8] sm:$0xff] (!%p325_p2)  ;;  %v411_v2 = vld [vmem:[%s9882_s2 + $0x10] sm:$0xff] (!%p325_p2)  ;;  %s6995_s21 = sshll.u32 (!%p325_p2), %s6990_s14, 3  ;;  %s6997_s22 = sshll.u32 (!%p325_p2), %s6990_s14, 4  ;;  %vm420_vm0 = vcmask (!%p325_p2), 261120  }
   0x6   : > { %328 = sbr.rel (%p325_p2) target bundleno = 3374 (0xd2e), region = 60  ;;  %v8078_v3 = vpack.c.bf16 (!%p325_p2), %v410_v1, %v409_v0  ;;  %v412_v4 = vld [vmem:[%s9882_s2 + $0x18] sm:$0xff] (!%p325_p2)  ;;  %p368_p3 = scmp.lt.s32.totalorder (!%p325_p2), %s6995_s21, 15  ;;  %v550_v6 = vld [vmem:[%s9884_s4] sm:$0xff] (!%p325_p2)  ;;  %v551_v7 = vld [vmem:[%s9884_s4 + $0x8] sm:$0xff] (!%p325_p2)  ;;  %v8744_v42 = vmov (!%p325_p2), 0.0|0.0  }
   0x7   : > { %p374_p4 = scmp.lt.s32.totalorder (!%p325_p2), %s6997_s22, 31  ;;  %v8082_v5 = vpack.c.bf16 (!%p325_p2), %v412_v4, %v411_v2  ;;  %v754_v8 = vld [vmem:[%s9886_s6] sm:$0xff] (!%p325_p2)  ;;  %v755_v9 = vld [vmem:[%s9886_s6 + $0x8] sm:$0xff] (!%p325_p2)  ;;  %v8086_v10 = vpack.c.bf16 (!%p325_p2), %v551_v7, %v550_v6  ;;  %v552_v11 = vld [vmem:[%s9884_s4 + $0x10] sm:$0xff] (!%p325_p2)  ;;  %vm8745_vm1 = vmmov (!%p325_p2), 0   ;;  %v8746_v43 = vmov (!%p325_p2), 0.0  }
   0x8   : > { %8326 = vmatprep.subr.bf16.mxu1 (!%p325_p2), %v8078_v3  ;;  %8079 = vmatprep.subr.bf16.mxu0 (!%p325_p2), %v8078_v3  ;;  %v553_v12 = vld [vmem:[%s9884_s4 + $0x18] sm:$0xff] (!%p325_p2)  ;;  %v8094_v13 = vpack.c.bf16 (!%p325_p2), %v755_v9, %v754_v8  ;;  %v756_v15 = vld [vmem:[%s9886_s6 + $0x10] sm:$0xff] (!%p325_p2)  ;;  %v8935_v50 = vld [vmem:[%s9885_s5] ss:$0 sm:$0xff] (!%p325_p2)  ;;  %vm910_vm2 = vcmask (!%p325_p2), 64512   ;;  %vm1543_vm4 = vcmask (!%p325_p2), 130048  }
   0x9   : > { %8328 = vmatpush3.bf16.msra.mxu1 (!%p325_p2), %v8078_v3  ;;  %8081 = vmatpush3.bf16.msra.mxu0 (!%p325_p2), %v8078_v3  ;;  %v757_v18 = vld [vmem:[%s9886_s6 + $0x18] sm:$0xff] (!%p325_p2)  ;;  %v8090_v20 = vpack.c.bf16 (!%p325_p2), %v553_v12, %v552_v11  ;;  %vm8945_vm3 = vmpackc.low (!%p325_p2), %vm910_vm2, %vm910_vm2  ;;  %v8965_v4 = vld [vmem:[%s9883_s3] ss:$0 sm:$0xff] (!%p325_p2)  ;;  %s8747_s19 = smov (!%p325_p2), 120   ;;  %s8748_s20 = smov (!%p325_p2), 112  }
   0xa   : > { %8327 = vmatprep.subr.bf16.mxu1 (!%p325_p2), %v8082_v5  ;;  %8083 = vmatprep.subr.bf16.mxu0 (!%p325_p2), %v8082_v5  ;;  %v8098_v22 = vpack.c.bf16 (!%p325_p2), %v757_v18, %v756_v15  ;;  %s8749_s27 = smov (!%p325_p2), 104  }
   0xd   : > { %s9898_s21 = smov (!%p368_p3, %s6995_s21), 15  ;;  %s9900_s22 = smov (!%p374_p4, %s6997_s22), 31  ;;  %8329 = vmatpush3.bf16.msra.mxu1 %v8082_v5  ;;  %8085 = vmatpush3.bf16.msra.mxu0 %v8082_v5 }
   0xe   : > { %s6996_s14 = sshll.u32 %s9898_s21, 3  ;;  %s6998_s24 = sshll.u32 %s9900_s22, 3  ;;  %8087 = vmatprep.subr.bf16.mxu1 %v8086_v10  ;;  %8095 = vmatprep.subr.bf16.mxu0 %v8094_v13 }
   0xf   : > { %s371_s17 = scalar_lea.vmem %s9880_s0, %s6996_s14  ;;  %s8861_s22 = scalar_lea.vmem %s9881_s1, %s6998_s24 }
  0x10   : > { %v389_v14 = vld [vmem:[%s371_s17 + $0x20] sm:$0xff]  ;;  %v390_v16 = vld [vmem:[%s371_s17 + $0x28] sm:$0xff]  ;;  %v391_v19 = vld [vmem:[%s371_s17 + $0x30] sm:$0xff] }
  0x11   : > { %7504 = vmatprep.mubr.msk.f32.mxu1 %vm420_vm0, %v389_v14  ;;  %v385_v17 = vld [vmem:[%s371_s17] sm:$0xff]  ;;  %v386_v21 = vld [vmem:[%s371_s17 + $0x8] sm:$0xff]  ;;  %v392_v23 = vld [vmem:[%s371_s17 + $0x38] sm:$0xff] }
  0x12   : > { %7498 = vmatprep.mubr.msk.f32.mxu0 %vm420_vm0, %v385_v17  ;;  %7505 = vmatmul.mubr.msk.f32.vlgmr.msra.gmra.mrb[0].mxu1 %vm420_vm0, %v390_v16  ;;  %v387_v24 = vld [vmem:[%s371_s17 + $0x10] sm:$0xff]  ;;  %v393_v25 = vld [vmem:[%s8861_s22] sm:$0xff]  ;;  %v388_v26 = vld [vmem:[%s371_s17 + $0x18] sm:$0xff]  ;;  %s383_s17 = scalar_lea.vmem %s9890_s10, %s6996_s14 }
  0x13   : > { %8089 = vmatpush3.bf16.msra.mxu1 %v8086_v10  ;;  %7507 = vmatprep.mubr.msk.f32.mxu1 %vm420_vm0, %v391_v19  ;;  %v394_v27 = vld [vmem:[%s8861_s22 + $0x8] sm:$0xff]  ;;  %v395_v28 = vld [vmem:[%s8861_s22 + $0x10] sm:$0xff]  ;;  %v396_v29 = vld [vmem:[%s8861_s22 + $0x18] sm:$0xff] }
  0x14   : > { %8091 = vmatprep.subr.bf16.mxu1 %v8090_v20  ;;  %7499 = vmatmul.mubr.msk.f32.vlgmr.msra.gmra.mrb[0].mxu0 %vm420_vm0, %v386_v21  ;;  %v397_v30 = vld [vmem:[%s8861_s22 + $0x20] sm:$0xff]  ;;  %v398_v31 = vld [vmem:[%s8861_s22 + $0x28] sm:$0xff]  ;;  %v399_v32 = vld [vmem:[%s8861_s22 + $0x30] sm:$0xff] }
  0x15   : > { %7501 = vmatprep.mubr.msk.f32.mxu0 %vm420_vm0, %v387_v24  ;;  %8097 = vmatpush3.bf16.msra.mxu0 %v8094_v13  ;;  %v400_v33 = vld [vmem:[%s8861_s22 + $0x38] sm:$0xff]  ;;  %v401_v34 = vld [vmem:[%s8861_s22 + $0x40] sm:$0xff]  ;;  %v402_v35 = vld [vmem:[%s8861_s22 + $0x48] sm:$0xff] }
  0x16   : > { %7508 = vmatmul.mubr.msk.f32.gmra.mrb[2].mxu1 %vm420_vm0, %v392_v23  ;;  %8099 = vmatprep.subr.bf16.mxu0 %v8098_v22  ;;  %v403_v36 = vld [vmem:[%s8861_s22 + $0x50] sm:$0xff]  ;;  %v404_v37 = vld [vmem:[%s8861_s22 + $0x58] sm:$0xff]  ;;  %v405_v38 = vld [vmem:[%s8861_s22 + $0x60] sm:$0xff] }
  0x17   : > { %8093 = vmatpush3.bf16.msra.mxu1 %v8090_v20  ;;  %7518 = vmatprep.mubr.msk.f32.mxu1 %vm420_vm0, %v393_v25  ;;  %v406_v39 = vld [vmem:[%s8861_s22 + $0x68] sm:$0xff]  ;;  %v407_v40 = vld [vmem:[%s8861_s22 + $0x70] sm:$0xff]  ;;  %v408_v41 = vld [vmem:[%s8861_s22 + $0x78] sm:$0xff] }
  0x18   : > { %7502 = vmatmul.mubr.msk.f32.gmra.mrb[2].mxu0 %vm420_vm0, %v388_v26  ;;  %8102 = vmatprep.subr.bf16.mxu1 %v8744_v42 }
  0x19   : > { %8101 = vmatpush3.bf16.msra.mxu0 %v8098_v22  ;;  %7550 = vmatprep.mubr.msk.f32.mxu0 %vm420_vm0, %v393_v25 }
  0x1a   : > { %7519 = vmatmul.mubr.msk.f32.vlgmr.msra.gmra.mrb[4].mxu1 %vm420_vm0, %v394_v27  ;;  %8110 = vmatprep.subr.bf16.mxu0 %v8744_v42 }
  0x1b   : > { %7521 = vmatprep.mubr.msk.f32.mxu1 %vm420_vm0, %v395_v28 }
  0x1c   : > { %7551 = vmatmul.mubr.msk.f32.vlgmr.msra.gmra.mrb[4].mxu0 %vm420_vm0, %v394_v27 }
  0x1d   : > { %7553 = vmatprep.mubr.msk.f32.mxu0 %vm420_vm0, %v395_v28 }
  0x1e   : > { %7522 = vmatmul.mubr.msk.f32.gmra.mrb[6].mxu1 %vm420_vm0, %v396_v29 }
  0x1f   : > { %7524 = vmatprep.mubr.msk.f32.mxu1 %vm420_vm0, %v397_v30 }
  0x20   : > { %7554 = vmatmul.mubr.msk.f32.gmra.mrb[6].mxu0 %vm420_vm0, %v396_v29 }
  0x21   : > { %7556 = vmatprep.mubr.msk.f32.mxu0 %vm420_vm0, %v397_v30 }
  0x22   : > { %7525 = vmatmul.mubr.msk.f32.gmra.mrb[8].mxu1 %vm420_vm0, %v398_v31 }
  0x23   : > { %7527 = vmatprep.mubr.msk.f32.mxu1 %vm420_vm0, %v399_v32 }
  0x24   : > { %7557 = vmatmul.mubr.msk.f32.gmra.mrb[8].mxu0 %vm420_vm0, %v398_v31 }
  0x25   : > { %7559 = vmatprep.mubr.msk.f32.mxu0 %vm420_vm0, %v399_v32 }
  0x26   : > { %7528 = vmatmul.mubr.msk.f32.gmra.mrb[10].mxu1 %vm420_vm0, %v400_v33 }
  0x27   : > { %7530 = vmatprep.mubr.msk.f32.mxu1 %vm420_vm0, %v401_v34 }
  0x28   : > { %7560 = vmatmul.mubr.msk.f32.gmra.mrb[10].mxu0 %vm420_vm0, %v400_v33 }
  0x29   : > { %7562 = vmatprep.mubr.msk.f32.mxu0 %vm420_vm0, %v401_v34 }
  0x2a   : > { %7531 = vmatmul.mubr.msk.f32.gmra.mrb[12].mxu1 %vm420_vm0, %v402_v35 }
  0x2b   : > { %7533 = vmatprep.mubr.msk.f32.mxu1 %vm420_vm0, %v403_v36 }
  0x2c   : > { %7563 = vmatmul.mubr.msk.f32.gmra.mrb[12].mxu0 %vm420_vm0, %v402_v35 }
  0x2d   : > { %7565 = vmatprep.mubr.msk.f32.mxu0 %vm420_vm0, %v403_v36 }
  0x2e   : > { %7534 = vmatmul.mubr.msk.f32.gmra.mrb[14].mxu1 %vm420_vm0, %v404_v37 }
  0x2f   : > { %7536 = vmatprep.mubr.msk.f32.mxu1 %vm420_vm0, %v405_v38 }
  0x30   : > { %7566 = vmatmul.mubr.msk.f32.gmra.mrb[14].mxu0 %vm420_vm0, %v404_v37 }
  0x31   : > { %7568 = vmatprep.mubr.msk.f32.mxu0 %vm420_vm0, %v405_v38 }
  0x32   : > { %7537 = vmatmul.mubr.msk.f32.gmra.mrb[16].mxu1 %vm420_vm0, %v406_v39 }
  0x33   : > { %7539 = vmatprep.mubr.msk.f32.mxu1 %vm420_vm0, %v407_v40 }
  0x34   : > { %7569 = vmatmul.mubr.msk.f32.gmra.mrb[16].mxu0 %vm420_vm0, %v406_v39 }
  0x35   : > { %7571 = vmatprep.mubr.msk.f32.mxu0 %vm420_vm0, %v407_v40 }
  0x36   : > { %7540 = vmatmul.mubr.msk.f32.gmra.mrb[18].mxu1 %vm420_vm0, %v408_v41 }
  0x37   : > { %7578 = vmatprep.mubr.msk.f32.mxu1 %vm8745_vm1, %v8746_v43 }
  0x38   : > { %7572 = vmatmul.mubr.msk.f32.gmra.mrb[18].mxu0 %vm420_vm0, %v408_v41 }
  0x39   : > { %7592 = vmatprep.mubr.msk.f32.mxu0 %vm8745_vm1, %v8746_v43 }
  0xe5   : > { %v8924_v44 = vpop.f32.mrb[0].mxu1 }
  0xe6   : > { %v8926_v45 = vpop.f32.mrb[1].mxu1 }
  0xe7   : > { %v7500_v46 = vpop.f32.mrb[0].mxu0 }
  0xe8   : > { %v511_v47 = vpop.f32.mrb[1].mxu0  ;;  %v9006_v30 = vadd.f32 %v7500_v46, %v8965_v4 }
  0xe9   : > { %v8928_v48 = vpop.f32.mrb[2].mxu1  ;;  %v8971_v10 = vadd.f32 %v8965_v4, %v511_v47 }
  0xea   : > { %v8930_v49 = vpop.f32.mrb[3].mxu1 }
  0xeb   : > { %v8937_v51 = vpop.f32.mrb[2].mxu0 }
  0xec   : > { %v521_v52 = vpop.f32.mrb[3].mxu0  ;;  %v9030_v40 = vadd.f32 %v8937_v51, %v8965_v4 }
  0xed   : > { %v7520_v53 = vpop.f32.mrb[4].mxu1  ;;  %v9000_v27 = vadd.f32 %v8965_v4, %v521_v52  ;;  %v9036_v52 = vadd.f32 %v8965_v4, %v8926_v45 }
  0xee   : > { %v681_v54 = vadd.f32 %v7520_v53, %v8935_v50  ;;  %v675_v55 = vpop.f32.mrb[5].mxu1 }
  0xef   : > { %v676_v56 = vadd.f32 %v8935_v50, %v675_v55  ;;  %v8941_v57 = vpop.f32.mrb[4].mxu0 }
  0xf0   : > { %v8949_v59 = vpop.f32.mrb[5].mxu0 }
  0xf1   : > { %v8103_v60 = vpack.c.bf16 %v681_v54, %v676_v56  ;;  %v7523_v61 = vpop.f32.mrb[6].mxu1  ;;  %v8951_v62 = vpack.i.bf16 %v681_v54, %v676_v56 }
  0xf2   : > { %v691_v63 = vadd.f32 %v7523_v61, %v8935_v50  ;;  %v685_v0 = vpop.f32.mrb[7].mxu1 }
  0xf3   : > { %8105 = vmatpush3.bf16.xpose.msk.msra.mxu1 %vm8945_vm3, %v8103_v60  ;;  %v686_v1 = vadd.f32 %v8935_v50, %v685_v0  ;;  %v8957_v2 = vpop.f32.mrb[6].mxu0 }
  0xf4   : > { %8106 = vmatprep.subr.bf16.mxu1 %v8744_v42  ;;  %v8960_v3 = vpop.f32.mrb[7].mxu0 }
  0xf5   : > { %v8107_v5 = vpack.c.bf16 %v691_v63, %v686_v1  ;;  %v7526_v6 = vpop.f32.mrb[8].mxu1  ;;  %v8967_v7 = vpack.i.bf16 %v691_v63, %v686_v1  ;;  %v9060_v63 = vadd.f32 %v8924_v44, %v8965_v4  ;;  %v9079_v44 = vadd.f32 %v8928_v48, %v8965_v4 }
  0xf6   : > { %v701_v8 = vadd.f32 %v7526_v6, %v8935_v50  ;;  %v695_v9 = vpop.f32.mrb[9].mxu1 }
  0xf7   : > { %v696_v11 = vadd.f32 %v8935_v50, %v695_v9  ;;  %v8974_v12 = vpop.f32.mrb[8].mxu0 }
  0xf8   : > { %v8976_v13 = vpop.f32.mrb[9].mxu0 }
  0xf9   : > { %v8111_v14 = vpack.c.bf16 %v701_v8, %v696_v11  ;;  %v7529_v15 = vpop.f32.mrb[10].mxu1  ;;  %v8978_v16 = vpack.i.bf16 %v701_v8, %v696_v11 }
  0xfa   : > { %7579 = vmatmul.mubr.msk.f32.vlgmr.msra.gmra.mrb[20].mxu1 %vm910_vm2, %v8971_v10  ;;  %v711_v17 = vadd.f32 %v7529_v15, %v8935_v50  ;;  %v705_v18 = vpop.f32.mrb[11].mxu1 }
  0xfb   : > { %8109 = vmatpush3.bf16.xpose.msk.msra.mxu1 %vm8945_vm3, %v8107_v5  ;;  %8113 = vmatpush3.bf16.xpose.msk.msra.mxu0 %vm8945_vm3, %v8111_v14  ;;  %v706_v19 = vadd.f32 %v8935_v50, %v705_v18  ;;  %v8988_v20 = vpop.f32.mrb[10].mxu0 }
  0xfc   : > { %7585 = vmatprep.mubr.msk.f32.mxu1 %vm8745_vm1, %v8746_v43  ;;  %8114 = vmatprep.subr.bf16.mxu1 %v8744_v42  ;;  %v8993_v21 = vpop.f32.mrb[11].mxu0 }
  0xfd   : > { %v8115_v22 = vpack.c.bf16 %v711_v17, %v706_v19  ;;  %v7532_v23 = vpop.f32.mrb[12].mxu1  ;;  %8118 = vmatprep.subr.bf16.mxu0 %v8744_v42  ;;  %v8996_v24 = vpack.i.bf16 %v711_v17, %v706_v19 }
  0xfe   : > { %v721_v25 = vadd.f32 %v7532_v23, %v8935_v50  ;;  %v715_v26 = vpop.f32.mrb[13].mxu1 }
  0xff   : > { %v716_v28 = vadd.f32 %v8935_v50, %v715_v26  ;;  %v9003_v29 = vpop.f32.mrb[12].mxu0 }
 0x101   : > { %v8119_v31 = vpack.c.bf16 %v721_v25, %v716_v28  ;;  %v7535_v32 = vpop.f32.mrb[14].mxu1  ;;  %v9008_v33 = vpack.i.bf16 %v721_v25, %v716_v28 }
 0x102   : > { %7586 = vmatmul.mubr.msk.f32.vlgmr.msra.gmra.mrb[22].mxu1 %vm910_vm2, %v9006_v30  ;;  %7593 = vmatmul.mubr.msk.f32.vlgmr.msra.gmra.mrb[20].mxu0 %vm910_vm2, %v9000_v27  ;;  %v731_v34 = vadd.f32 %v7535_v32, %v8935_v50  ;;  %v725_v35 = vpop.f32.mrb[15].mxu1 }
 0x103   : > { %8117 = vmatpush3.bf16.xpose.msk.msra.mxu1 %vm8945_vm3, %v8115_v22  ;;  %8121 = vmatpush3.bf16.xpose.msk.msra.mxu0 %vm8945_vm3, %v8119_v31  ;;  %v726_v36 = vadd.f32 %v8935_v50, %v725_v35 }
 0x104   : > { %7599 = vmatprep.mubr.msk.f32.mxu1 %vm8745_vm1, %v8746_v43  ;;  %7606 = vmatprep.mubr.msk.f32.mxu0 %vm8745_vm1, %v8746_v43 }
 0x105   : > { %v8123_v37 = vpack.c.bf16 %v731_v34, %v726_v36  ;;  %v7538_v38 = vpop.f32.mrb[16].mxu1  ;;  %8122 = vmatprep.subr.bf16.mxu1 %v8744_v42  ;;  %8126 = vmatprep.subr.bf16.mxu0 %v8744_v42  ;;  %v9026_v39 = vpack.i.bf16 %v731_v34, %v726_v36 }
 0x106   : > { %v741_v41 = vadd.f32 %v7538_v38, %v8935_v50  ;;  %v735_v46 = vpop.f32.mrb[17].mxu1 }
 0x107   : > { %v736_v47 = vadd.f32 %v8935_v50, %v735_v46 }
 0x109   : > { %v8127_v53 = vpack.c.bf16 %v741_v41, %v736_v47  ;;  %v7541_v54 = vpop.f32.mrb[18].mxu1  ;;  %v9038_v55 = vpack.i.bf16 %v741_v41, %v736_v47 }
 0x10a   : > { %7600 = vmatmul.mubr.msk.f32.vlgmr.msra.gmra.mrb[24].mxu1 %vm910_vm2, %v9030_v40  ;;  %7607 = vmatmul.mubr.msk.f32.vlgmr.msra.gmra.mrb[22].mxu0 %vm910_vm2, %v9036_v52  ;;  %v751_v51 = vadd.f32 %v7541_v54, %v8935_v50  ;;  %v745_v56 = vpop.f32.mrb[19].mxu1 }
 0x10b   : > { %8125 = vmatpush3.bf16.xpose.msk.msra.mxu1 %vm8945_vm3, %v8123_v37  ;;  %8129 = vmatpush3.bf16.xpose.msk.msra.mxu0 %vm8945_vm3, %v8127_v53  ;;  %v746_v45 = vadd.f32 %v8935_v50, %v745_v56  ;;  %v9064_v50 = vadd.f32 %v8965_v4, %v8930_v49  ;;  %v7027_v49 = vld [vmem:[%s9887_s7] ss:$0 sm:$0xff] }
 0x10c   : > { %7613 = vmatprep.mubr.msk.f32.mxu1 %vm8745_vm1, %v8746_v43  ;;  %7620 = vmatprep.mubr.msk.f32.mxu0 %vm8745_vm1, %v8746_v43  ;;  %v837_v0 = vadd.f32 %v8941_v57, %v7027_v49  ;;  %v832_v1 = vadd.f32 %v7027_v49, %v8949_v59  ;;  %v847_v5 = vadd.f32 %v8957_v2, %v7027_v49 }
 0x10d   : > { %v8131_v60 = vpack.c.bf16 %v751_v51, %v746_v45  ;;  %8130 = vmatprep.subr.bf16.mxu1 %v8744_v42  ;;  %8134 = vmatprep.subr.bf16.mxu0 %v8744_v42  ;;  %v9056_v61 = vpack.i.bf16 %v751_v51, %v746_v45  ;;  %v842_v6 = vadd.f32 %v7027_v49, %v8960_v3 }
 0x10e   : > { %v8135_v48 = vpack.c.bf16 %v837_v0, %v832_v1  ;;  %v9092_v4 = vpack.i.bf16 %v837_v0, %v832_v1  ;;  %v9096_v9 = vadd.f32 %v8974_v12, %v7027_v49  ;;  %v9099_v11 = vadd.f32 %v7027_v49, %v8976_v13  ;;  %v871_v13 = vpop.f32.mrb[13].mxu0 }
 0x10f   : > { %v8138_v8 = vpack.c.bf16 %v847_v5, %v842_v6  ;;  %v9101_v57 = vpack.i.bf16 %v847_v5, %v842_v6  ;;  %v9105_v59 = vadd.f32 %v8988_v20, %v7027_v49  ;;  %v9108_v2 = vadd.f32 %v7027_v49, %v8993_v21  ;;  %v7567_v18 = vpop.f32.mrb[14].mxu0 }
 0x110   : > { %v8141_v3 = vpack.c.bf16 %v9096_v9, %v9099_v11  ;;  %v9114_v12 = vpack.i.bf16 %v9096_v9, %v9099_v11  ;;  %v9119_v15 = vadd.f32 %v9003_v29, %v7027_v49  ;;  %v9121_v17 = vadd.f32 %v7027_v49, %v871_v13  ;;  %v881_v20 = vpop.f32.mrb[15].mxu0 }
 0x111   : > { %v9125_v19 = vpack.i.bf16 %v9105_v59, %v9108_v2  ;;  %v7570_v21 = vpop.f32.mrb[16].mxu0  ;;  %v9127_v23 = vadd.f32 %v7567_v18, %v7027_v49  ;;  %v9129_v25 = vadd.f32 %v7027_v49, %v881_v20  ;;  %v9893_v9 = vpack.c.bf16 %v9105_v59, %v9108_v2 }
 0x112   : > { %7614 = vmatmul.mubr.msk.f32.vlgmr.msra.gmra.mrb[26].mxu1 %vm910_vm2, %v9060_v63  ;;  %7621 = vmatmul.mubr.msk.f32.vlgmr.msra.gmra.mrb[24].mxu0 %vm910_vm2, %v9064_v50  ;;  %v891_v22 = vpop.f32.mrb[17].mxu0  ;;  %v8147_v28 = vpack.c.bf16 %v9119_v15, %v9121_v17  ;;  %v9135_v29 = vpack.i.bf16 %v9119_v15, %v9121_v17  ;;  %v9137_v32 = vadd.f32 %v7570_v21, %v7027_v49 }
 0x113   : > { %8133 = vmatpush3.bf16.xpose.msk.msra.mxu1 %vm8945_vm3, %v8131_v60  ;;  %7627 = vmatprep.mubr.msk.f32.mxu1 %vm8745_vm1, %v8746_v43  ;;  %v7573_v26 = vpop.f32.mrb[18].mxu0  ;;  %v9139_v34 = vadd.f32 %v7027_v49, %v891_v22  ;;  %v9145_v36 = vpack.i.bf16 %v9127_v23, %v9129_v25 }
 0x114   : > { %8137 = vmatprep.subr.bf16.mxu1 %v8744_v42  ;;  %7634 = vmatprep.mubr.msk.f32.mxu0 %vm8745_vm1, %v8746_v43  ;;  %v901_v31 = vpop.f32.mrb[19].mxu0  ;;  %v9147_v37 = vadd.f32 %v7573_v26, %v7027_v49 }
 0x115   : > { %8136 = vmatpush3.bf16.msra.mxu0 %v8135_v48  ;;  %v9149_v38 = vadd.f32 %v7027_v49, %v901_v31  ;;  %v9155_v46 = vpack.i.bf16 %v9137_v32, %v9139_v34 }
 0x116   : > { %8140 = vmatprep.subr.bf16.mxu0 %v8744_v42 }
 0x117   : > { %v9161_v53 = vpack.i.bf16 %v9147_v37, %v9149_v38 }
 0x11a   : > { %7628 = vmatmul.mubr.msk.f32.vlgmr.msra.gmra.mrb[28].mxu1 %vm910_vm2, %v9079_v44 }
 0x11b   : > { %7641 = vmatprep.mubr.msk.f32.mxu1 %vm8745_vm1, %v8746_v43  ;;  %8139 = vmatpush3.bf16.msra.mxu1 %v8138_v8 }
 0x11c   : > { %8143 = vmatprep.subr.bf16.mxu1 %v8744_v42 }
 0x1cd   : > { %v986_v54 = vpop.f32.mrb[20].mxu1 }
 0x1ce   : > { %v1544_v51 = vsel %vm1543_vm4, %v986_v54, -inf  ;;  %v7580_v56 = vpop.f32.mrb[21].mxu1 }
 0x1cf   : > { %1545 = vmax.xlane.f32.xlu0 %v1544_v51 }
 0x1d5   : > { %v1065_v45 = vpop.f32.mrb[22].mxu1  ;;  %v1144_v60 = vpop.f32.mrb[20].mxu0 }
 0x1d6   : > { %v1550_v49 = vsel %vm1543_vm4, %v1144_v60, -inf  ;;  %v1547_v0 = vsel %vm1543_vm4, %v1065_v45, -inf  ;;  %v7587_v1 = vpop.f32.mrb[23].mxu1  ;;  %v7594_v5 = vpop.f32.mrb[21].mxu0 }
 0x1d7   : > { %1551 = vmax.xlane.f32.xlu1 %v1550_v49  ;;  %1548 = vmax.xlane.f32.xlu0 %v1547_v0 }
 0x1dd   : > { %v1223_v6 = vpop.f32.mrb[24].mxu1  ;;  %v1302_v48 = vpop.f32.mrb[22].mxu0 }
 0x1de   : > { %v7608_v8 = vpop.f32.mrb[23].mxu0  ;;  %v1556_v13 = vsel %vm1543_vm4, %v1302_v48, -inf  ;;  %v1553_v18 = vsel %vm1543_vm4, %v1223_v6, -inf  ;;  %v7601_v20 = vpop.f32.mrb[25].mxu1 }
 0x1df   : > { %1557 = vmax.xlane.f32.xlu0 %v1556_v13  ;;  %1554 = vmax.xlane.f32.xlu1 %v1553_v18 }
 0x1e5   : > { %v1381_v21 = vpop.f32.mrb[26].mxu1  ;;  %v1460_v22 = vpop.f32.mrb[24].mxu0 }
 0x1e6   : > { %v7615_v26 = vpop.f32.mrb[27].mxu1  ;;  %v7622_v31 = vpop.f32.mrb[25].mxu0  ;;  %v1562_v51 = vsel %vm1543_vm4, %v1460_v22, -inf  ;;  %v1559_v56 = vsel %vm1543_vm4, %v1381_v21, -inf }
 0x1e7   : > { %1563 = vmax.xlane.f32.xlu0 %v1562_v51  ;;  %1560 = vmax.xlane.f32.xlu1 %v1559_v56 }
 0x1ed   : > { %v9170_v49 = vpop.f32.mrb[28].mxu1 }
 0x1ee   : > { %v7629_v0 = vpop.f32.mrb[29].mxu1  ;;  %v1565_v1 = vsel %vm1543_vm4, %v9170_v49, -inf }
 0x1ef   : > { %1566 = vmax.xlane.f32.xlu1 %v1565_v1 }
 0x25c   : > { %v1546_v5 = vpop.xlane.xlu0 %1545 }
 0x25d   : > { %v1568_v8 = vsub.f32 %v986_v54, %v1546_v5 }
 0x25f   : > { %v1576_v13 = vmul.f32 1.442695, %v1568_v8 }
 0x261   : > { %8608 = vpow2.f32 %v1576_v13 }
 0x264   : > { %v1552_v18 = vpop.xlane.xlu1 %1551  ;;  %v1549_v20 = vpop.xlane.xlu0 %1548 }
 0x265   : > { %v1570_v26 = vsub.f32 %v1144_v60, %v1552_v18  ;;  %v1569_v31 = vsub.f32 %v1065_v45, %v1549_v20 }
 0x267   : > { %v1580_v47 = vmul.f32 1.442695, %v1570_v26  ;;  %v1578_v35 = vmul.f32 1.442695, %v1569_v31 }
 0x269   : > { %8610 = vpow2.f32 %v1580_v47 }
 0x26a   : > { %8612 = vpow2.f32 %v1578_v35 }
 0x26b   : > { %v9174_v51 = vpop.eup %8608 }
 0x26c   : > { %v1558_v56 = vpop.xlane.xlu0 %1557  ;;  %v1555_v0 = vpop.xlane.xlu1 %1554  ;;  %v1592_v41 = vsel %vm1543_vm4, %v9174_v51, 0.0 }
 0x26d   : > { %v1572_v1 = vsub.f32 %v1302_v48, %v1558_v56  ;;  %v1571_v14 = vsub.f32 %v1223_v6, %v1555_v0  ;;  %1593 = vadd.xlane.f32.xlu0 %v1592_v41 }
 0x26f   : > { %v1584_v54 = vmul.f32 1.442695, %v1572_v1  ;;  %v1582_v5 = vmul.f32 1.442695, %v1571_v14 }
 0x271   : > { %8614 = vpow2.f32 %v1584_v54 }
 0x272   : > { %8616 = vpow2.f32 %v1582_v5 }
 0x273   : > { %v9178_v60 = vpop.eup %8610 }
 0x274   : > { %v9180_v45 = vpop.eup %8612  ;;  %v1564_v47 = vpop.xlane.xlu0 %1563  ;;  %v1598_v8 = vsel %vm1543_vm4, %v9178_v60, 0.0 }
 0x275   : > { %v1561_v35 = vpop.xlane.xlu1 %1560  ;;  %v1574_v13 = vsub.f32 %v1460_v22, %v1564_v47  ;;  %1599 = vadd.xlane.f32.xlu0 %v1598_v8  ;;  %v1595_v6 = vsel %vm1543_vm4, %v9180_v45, 0.0 }
 0x276   : > { %v1573_v18 = vsub.f32 %v1381_v21, %v1561_v35  ;;  %1596 = vadd.xlane.f32.xlu1 %v1595_v6 }
 0x277   : > { %v1588_v41 = vmul.f32 1.442695, %v1574_v13 }
 0x278   : > { %v1586_v14 = vmul.f32 1.442695, %v1573_v18 }
 0x279   : > { %8618 = vpow2.f32 %v1588_v41 }
 0x27a   : > { %8620 = vpow2.f32 %v1586_v14 }
 0x27b   : > { %v9186_v48 = vpop.eup %8614 }
 0x27c   : > { %v9188_v20 = vpop.eup %8616  ;;  %v1604_v26 = vsel %vm1543_vm4, %v9186_v48, 0.0  ;;  %v1567_v1 = vpop.xlane.xlu1 %1566 }
 0x27d   : > { %1605 = vadd.xlane.f32.xlu0 %v1604_v26  ;;  %v1601_v21 = vsel %vm1543_vm4, %v9188_v20, 0.0  ;;  %v1575_v54 = vsub.f32 %v9170_v49, %v1567_v1 }
 0x27e   : > { %1602 = vadd.xlane.f32.xlu1 %v1601_v21 }
 0x27f   : > { %v1590_v5 = vmul.f32 1.442695, %v1575_v54 }
 0x281   : > { %8622 = vpow2.f32 %v1590_v5 }
 0x283   : > { %v9194_v22 = vpop.eup %8618 }
 0x284   : > { %v9196_v31 = vpop.eup %8620  ;;  %v1610_v56 = vsel %vm1543_vm4, %v9194_v22, 0.0 }
 0x285   : > { %1611 = vadd.xlane.f32.xlu0 %v1610_v56  ;;  %v1607_v0 = vsel %vm1543_vm4, %v9196_v31, 0.0 }
 0x286   : > { %1608 = vadd.xlane.f32.xlu1 %v1607_v0 }
 0x28b   : > { %v9223_v47 = vpop.eup %8622 }
 0x28c   : > { %v1613_v35 = vsel %vm1543_vm4, %v9223_v47, 0.0 }
 0x297   : > { %8374 = vrot.lane.b32.xlu1 %v8967_v7, %s8747_s19 }
 0x29b   : > { %8379 = vrot.lane.b32.xlu1 %v8978_v16, %s8747_s19  ;;  %8369 = vrot.lane.b32.xlu0 %v8951_v62, %s8747_s19 }
 0x29f   : > { %8384 = vrot.lane.b32.xlu1 %v8996_v24, %s8747_s19  ;;  %2217 = vrot.lane.b32.xlu0 %v8971_v10, %s8747_s19 }
 0x2a3   : > { %8389 = vrot.lane.b32.xlu0 %v9008_v33, %s8747_s19 }
 0x2a7   : > { %2381 = vrot.lane.b32.xlu0 %v9000_v27, %s8747_s19 }
 0x2ab   : > { %8399 = vrot.lane.b32.xlu0 %v9038_v55, %s8747_s19 }
 0x2af   : > { %2545 = vrot.lane.b32.xlu0 %v9036_v52, %s8747_s19 }
 0x2b3   : > { %2709 = vrot.lane.b32.xlu0 %v9064_v50, %s8747_s19 }
 0x2c3   : > { %1614 = vadd.xlane.f32.xlu1 %v1613_v35  ;;  %v9896_v35 = vpack.c.bf16 %v9147_v37, %v9149_v38 }
 0x2d4   : > { %2299 = vrot.lane.b32.xlu1 %v9006_v30, %s8747_s19 }
 0x2d8   : > { %8394 = vrot.lane.b32.xlu1 %v9026_v39, %s8747_s19 }
 0x2dc   : > { %2463 = vrot.lane.b32.xlu1 %v9030_v40, %s8747_s19 }
 0x2e0   : > { %8404 = vrot.lane.b32.xlu1 %v9056_v61, %s8747_s19 }
 0x2e4   : > { %2627 = vrot.lane.b32.xlu1 %v9060_v63, %s8747_s19 }
 0x2e8   : > { %2791 = vrot.lane.b32.xlu1 %v9079_v44, %s8747_s19 }
 0x2fa   : > { %v1594_v49 = vpop.xlane.xlu0 %1593 }
 0x2fb   : > { %8624 = vrcp.f32 %v1594_v49 }
 0x302   : > { %v1600_v8 = vpop.xlane.xlu0 %1599 }
 0x303   : > { %8626 = vrcp.f32 %v1600_v8  ;;  %v1597_v13 = vpop.xlane.xlu1 %1596 }
 0x304   : > { %8628 = vrcp.f32 %v1597_v13 }
 0x305   : > { %v8625_v18 = vpop.eup %8624 }
 0x306   : > { %v1624_v6 = vmul.f32 %v8625_v18, %v9174_v51 }
 0x308   : > { %7635 = vmatmul.mubr.msk.f32.vlgmr.msra.gmra.mrb[26].mxu0 %vm1543_vm4, %v1624_v6 }
 0x309   : > { %8142 = vmatpush3.bf16.msra.mxu0 %v8141_v3  ;;  %7648 = vmatprep.mubr.msk.f32.mxu0 %vm8745_vm1, %v8746_v43 }
 0x30a   : > { %v1606_v41 = vpop.xlane.xlu0 %1605  ;;  %8146 = vmatprep.subr.bf16.mxu0 %v8744_v42 }
 0x30b   : > { %8630 = vrcp.f32 %v1606_v41  ;;  %v1603_v14 = vpop.xlane.xlu1 %1602 }
 0x30c   : > { %8632 = vrcp.f32 %v1603_v14 }
 0x30d   : > { %v8627_v26 = vpop.eup %8626 }
 0x30e   : > { %v8629_v21 = vpop.eup %8628  ;;  %v1626_v56 = vmul.f32 %v8627_v26, %v9178_v60  ;;  %v9894_v60 = vpack.c.bf16 %v9137_v32, %v9139_v34 }
 0x30f   : > { %v1625_v51 = vmul.f32 %v8629_v21, %v9180_v45  ;;  %v9895_v45 = vpack.c.bf16 %v9127_v23, %v9129_v25 }
 0x310   : > { %7649 = vmatmul.mubr.msk.f32.vlgmr.msra.gmra.mrb[28].mxu0 %vm1543_vm4, %v1626_v56 }
 0x311   : > { %7642 = vmatmul.mubr.msk.f32.vlgmr.msra.gmra.mrb[30].mxu1 %vm1543_vm4, %v1625_v51  ;;  %8148 = vmatpush3.bf16.msra.mxu0 %v8147_v28 }
 0x312   : > { %8145 = vmatpush3.bf16.msra.mxu1 %v9893_v9  ;;  %v1612_v11 = vpop.xlane.xlu0 %1611  ;;  %7655 = vmatprep.mubr.msk.f32.mxu1 %vm8745_vm1, %v8746_v43 }
 0x313   : > { %8634 = vrcp.f32 %v1612_v11  ;;  %v1609_v3 = vpop.xlane.xlu1 %1608  ;;  %7662 = vmatprep.mubr.msk.f32.mxu0 %vm8745_vm1, %v8746_v43  ;;  %8149 = vmatprep.subr.bf16.mxu1 %v8744_v42 }
 0x314   : > { %8636 = vrcp.f32 %v1609_v3  ;;  %8152 = vmatprep.subr.bf16.mxu0 %v8744_v42 }
 0x315   : > { %v8631_v15 = vpop.eup %8630 }
 0x316   : > { %v8633_v17 = vpop.eup %8632  ;;  %v1628_v28 = vmul.f32 %v8631_v15, %v9186_v48  ;;  %v8370_v2 = vpop.permute.xlu0 %8369 }
 0x317   : > { %v1627_v59 = vmul.f32 %v8633_v17, %v9188_v20  ;;  %v8375_v0 = vpop.permute.xlu1 %8374  ;;  %v8372_v48 = vunpack.i.h.bf16 %v8370_v2  ;;  %v8371_v20 = vunpack.i.l.bf16 %v8370_v2 }
 0x318   : > { %7663 = vmatmul.mubr.msk.f32.vlgmr.msra.gmra.mrb[30].mxu0 %vm1543_vm4, %v1628_v28  ;;  %v8377_v11 = vunpack.i.h.bf16 %v8375_v0  ;;  %v8376_v3 = vunpack.i.l.bf16 %v8375_v0 }
 0x319   : > { %7656 = vmatmul.mubr.msk.f32.vlgmr.msra.gmra.mrb[32].mxu1 %vm1543_vm4, %v1627_v59  ;;  %8154 = vmatpush3.bf16.msra.mxu0 %v9894_v60  ;;  %v8159_v25 = vpack.c.bf16 %v8372_v48, %v8371_v20 }
 0x31a   : > { %8151 = vmatpush3.bf16.msra.mxu1 %v9895_v45  ;;  %7669 = vmatprep.mubr.msk.f32.mxu1 %vm8745_vm1, %v8746_v43  ;;  %v2218_v54 = vpop.permute.xlu0 %2217  ;;  %v8163_v59 = vpack.c.bf16 %v8377_v11, %v8376_v3 }
 0x31b   : > { %7676 = vmatprep.mubr.msk.f32.mxu0 %vm8745_vm1, %v8746_v43  ;;  %8155 = vmatprep.subr.bf16.mxu1 %v8744_v42  ;;  %v8380_v5 = vpop.permute.xlu1 %8379 }
 0x31c   : > { %8158 = vmatprep.subr.bf16.mxu0 %v8744_v42 }
 0x31d   : > { %v8635_v1 = vpop.eup %8634 }
 0x31e   : > { %v8637_v32 = vpop.eup %8636  ;;  %v1630_v34 = vmul.f32 %v8635_v1, %v9194_v22  ;;  %v8382_v22 = vunpack.i.h.bf16 %v8380_v5  ;;  %v8390_v49 = vpop.permute.xlu0 %8389 }
 0x31f   : > { %v1629_v23 = vmul.f32 %v8637_v32, %v9196_v31  ;;  %v8381_v31 = vunpack.i.l.bf16 %v8380_v5  ;;  %v8392_v38 = vunpack.i.h.bf16 %v8390_v49  ;;  %v8391_v13 = vunpack.i.l.bf16 %v8390_v49  ;;  %v8385_v51 = vpop.permute.xlu1 %8384 }
 0x320   : > { %7677 = vmatmul.mubr.msk.f32.vlgmr.msra.gmra.mrb[32].mxu0 %vm1543_vm4, %v1630_v34  ;;  %v8387_v2 = vunpack.i.h.bf16 %v8385_v51  ;;  %v8386_v60 = vunpack.i.l.bf16 %v8385_v51 }
 0x321   : > { %7670 = vmatmul.mubr.msk.f32.vlgmr.msra.gmra.mrb[34].mxu1 %vm1543_vm4, %v1629_v23  ;;  %7690 = vmatprep.mubr.msk.f32.mxu0 %vm8745_vm1, %v8746_v43  ;;  %v8167_v8 = vpack.c.bf16 %v8382_v22, %v8381_v31  ;;  %v8175_v18 = vpack.c.bf16 %v8392_v38, %v8391_v13 }
 0x322   : > { %8157 = vmatpush3.bf16.msra.mxu1 %v9896_v35  ;;  %8161 = vmatpush3.bf16.xpose.msk.msra.mxu0 %vm8945_vm3, %v8159_v25  ;;  %v2382_v37 = vpop.permute.xlu0 %2381  ;;  %v8171_v48 = vpack.c.bf16 %v8387_v2, %v8386_v60 }
 0x323   : > { %8166 = vmatprep.subr.bf16.mxu0 %v8744_v42  ;;  %7683 = vmatprep.mubr.msk.f32.mxu1 %vm8745_vm1, %v8746_v43 }
 0x324   : > { %8162 = vmatprep.subr.bf16.mxu1 %v8744_v42 }
 0x326   : > { %v8400_v6 = vpop.permute.xlu0 %8399 }
 0x327   : > { %v8402_v41 = vunpack.i.h.bf16 %v8400_v6  ;;  %v8401_v14 = vunpack.i.l.bf16 %v8400_v6 }
 0x329   : > { %7691 = vmatmul.mubr.msk.f32.vlgmr.msra.gmra.mrb[34].mxu0 %vm910_vm2, %v2218_v54  ;;  %v8183_v26 = vpack.c.bf16 %v8402_v41, %v8401_v14 }
 0x32a   : > { %8169 = vmatpush3.bf16.xpose.msk.msra.mxu0 %vm8945_vm3, %v8167_v8  ;;  %7704 = vmatprep.mubr.msk.f32.mxu0 %vm8745_vm1, %v8746_v43  ;;  %v2546_v21 = vpop.permute.xlu0 %2545 }
 0x32b   : > { %8174 = vmatprep.subr.bf16.mxu0 %v8744_v42 }
 0x32e   : > { %v2710_v56 = vpop.permute.xlu0 %2709 }
 0x331   : > { %7705 = vmatmul.mubr.msk.f32.vlgmr.msra.gmra.mrb[36].mxu0 %vm910_vm2, %v2382_v37 }
 0x332   : > { %8177 = vmatpush3.bf16.xpose.msk.msra.mxu0 %vm8945_vm3, %v8175_v18  ;;  %7718 = vmatprep.mubr.msk.f32.mxu0 %vm8745_vm1, %v8746_v43 }
 0x333   : > { %8182 = vmatprep.subr.bf16.mxu0 %v8744_v42 }
 0x339   : > { %7719 = vmatmul.mubr.msk.f32.vlgmr.msra.gmra.mrb[38].mxu0 %vm910_vm2, %v2546_v21 }
 0x33a   : > { %8185 = vmatpush3.bf16.xpose.msk.msra.mxu0 %vm8945_vm3, %v8183_v26  ;;  %7732 = vmatprep.mubr.msk.f32.mxu0 %vm8745_vm1, %v8746_v43 }
 0x33b   : > { %8190 = vmatprep.subr.bf16.mxu0 %v8744_v42 }
 0x341   : > { %7733 = vmatmul.mubr.msk.f32.vlgmr.msra.gmra.mrb[40].mxu0 %vm910_vm2, %v2710_v56 }
 0x342   : > { %7746 = vmatprep.mubr.msk.f32.mxu0 %vm8745_vm1, %v8746_v43 }
 0x350   : > { %v1615_v9 = vpop.xlane.xlu1 %1614 }
 0x351   : > { %8638 = vrcp.f32 %v1615_v9 }
 0x354   : > { %v2300_v17 = vpop.permute.xlu1 %2299 }
 0x358   : > { %v8395_v45 = vpop.permute.xlu1 %8394 }
 0x359   : > { %v8397_v0 = vunpack.i.h.bf16 %v8395_v45  ;;  %v8396_v20 = vunpack.i.l.bf16 %v8395_v45 }
 0x35b   : > { %v8639_v15 = vpop.eup %8638  ;;  %v8179_v1 = vpack.c.bf16 %v8397_v0, %v8396_v20 }
 0x35c   : > { %v1631_v28 = vmul.f32 %v8639_v15, %v9223_v47  ;;  %v2464_v47 = vpop.permute.xlu1 %2463 }
 0x35e   : > { %7684 = vmatmul.mubr.msk.f32.vlgmr.msra.gmra.mrb[36].mxu1 %vm1543_vm4, %v1631_v28 }
 0x35f   : > { %8165 = vmatpush3.bf16.xpose.msk.msra.mxu1 %vm8945_vm3, %v8163_v59  ;;  %7697 = vmatprep.mubr.msk.f32.mxu1 %vm8745_vm1, %v8746_v43 }
 0x360   : > { %8170 = vmatprep.subr.bf16.mxu1 %v8744_v42  ;;  %v8405_v32 = vpop.permute.xlu1 %8404 }
 0x361   : > { %v8407_v34 = vunpack.i.h.bf16 %v8405_v32  ;;  %v8406_v54 = vunpack.i.l.bf16 %v8405_v32 }
 0x363   : > { %v8187_v23 = vpack.c.bf16 %v8407_v34, %v8406_v54 }
 0x364   : > { %v2628_v25 = vpop.permute.xlu1 %2627 }
 0x366   : > { %7698 = vmatmul.mubr.msk.f32.vlgmr.msra.gmra.mrb[38].mxu1 %vm910_vm2, %v2300_v17 }
 0x367   : > { %8173 = vmatpush3.bf16.xpose.msk.msra.mxu1 %vm8945_vm3, %v8171_v48  ;;  %7711 = vmatprep.mubr.msk.f32.mxu1 %vm8745_vm1, %v8746_v43 }
 0x368   : > { %8178 = vmatprep.subr.bf16.mxu1 %v8744_v42  ;;  %v2792_v5 = vpop.permute.xlu1 %2791 }
 0x36e   : > { %7712 = vmatmul.mubr.msk.f32.vlgmr.msra.gmra.mrb[40].mxu1 %vm910_vm2, %v2464_v47 }
 0x36f   : > { %8181 = vmatpush3.bf16.xpose.msk.msra.mxu1 %vm8945_vm3, %v8179_v1  ;;  %7725 = vmatprep.mubr.msk.f32.mxu1 %vm8745_vm1, %v8746_v43 }
 0x370   : > { %8186 = vmatprep.subr.bf16.mxu1 %v8744_v42 }
 0x376   : > { %7726 = vmatmul.mubr.msk.f32.vlgmr.msra.gmra.mrb[42].mxu1 %vm910_vm2, %v2628_v25 }
 0x377   : > { %8189 = vmatpush3.bf16.xpose.msk.msra.mxu1 %vm8945_vm3, %v8187_v23  ;;  %7739 = vmatprep.mubr.msk.f32.mxu1 %vm8745_vm1, %v8746_v43 }
 0x378   : > { %8193 = vmatprep.subr.bf16.mxu1 %v8744_v42 }
 0x37e   : > { %7740 = vmatmul.mubr.msk.f32.vlgmr.msra.gmra.mrb[44].mxu1 %vm910_vm2, %v2792_v5 }
 0x37f   : > { %7753 = vmatprep.mubr.msk.f32.mxu1 %vm8745_vm1, %v8746_v43 }
 0x3db   : > { %v9343_v35 = vpop.f32.mrb[26].mxu0 }
 0x3dc   : > { %v7636_v22 = vpop.f32.mrb[27].mxu0 }
 0x3e3   : > { %v9345_v31 = vpop.f32.mrb[28].mxu0 }
 0x3e4   : > { %v9347_v49 = vpop.f32.mrb[30].mxu1  ;;  %v7650_v8 = vpop.f32.mrb[29].mxu0 }
 0x3e5   : > { %v7643_v37 = vpop.f32.mrb[31].mxu1 }
 0x3eb   : > { %v9349_v38 = vpop.f32.mrb[30].mxu0 }
 0x3ec   : > { %v9351_v13 = vpop.f32.mrb[32].mxu1  ;;  %v7664_v18 = vpop.f32.mrb[31].mxu0 }
 0x3ed   : > { %v7657_v6 = vpop.f32.mrb[33].mxu1 }
 0x3f3   : > { %v9353_v41 = vpop.f32.mrb[32].mxu0 }
 0x3f4   : > { %v9355_v14 = vpop.f32.mrb[34].mxu1  ;;  %v7678_v26 = vpop.f32.mrb[33].mxu0 }
 0x3f5   : > { %v7671_v21 = vpop.f32.mrb[35].mxu1 }
 0x3fc   : > { %v2295_v56 = vpop.f32.mrb[34].mxu0 }
 0x3fd   : > { %v7692_v51 = vpop.f32.mrb[35].mxu0  ;;  %v2873_v9 = vsel %vm1543_vm4, %v2295_v56, -inf }
 0x3fe   : > { %2874 = vmax.xlane.f32.xlu0 %v2873_v9 }
 0x404   : > { %v2459_v11 = vpop.f32.mrb[36].mxu0 }
 0x405   : > { %v7706_v3 = vpop.f32.mrb[37].mxu0  ;;  %v2879_v15 = vsel %vm1543_vm4, %v2459_v11, -inf }
 0x406   : > { %2880 = vmax.xlane.f32.xlu0 %v2879_v15 }
 0x40c   : > { %v2623_v17 = vpop.f32.mrb[38].mxu0 }
 0x40d   : > { %v7720_v28 = vpop.f32.mrb[39].mxu0  ;;  %v2885_v34 = vsel %vm1543_vm4, %v2623_v17, -inf }
 0x414   : > { %v9359_v59 = vpop.f32.mrb[40].mxu0 }
 0x415   : > { %v7734_v2 = vpop.f32.mrb[41].mxu0  ;;  %v2891_v25 = vsel %vm1543_vm4, %v9359_v59, -inf }
 0x431   : > { %v9361_v60 = vpop.f32.mrb[36].mxu1 }
 0x432   : > { %v7685_v45 = vpop.f32.mrb[37].mxu1 }
 0x439   : > { %v2377_v48 = vpop.f32.mrb[38].mxu1 }
 0x43a   : > { %v7699_v47 = vpop.f32.mrb[39].mxu1  ;;  %v2876_v0 = vsel %vm1543_vm4, %v2377_v48, -inf }
 0x43b   : > { %2877 = vmax.xlane.f32.xlu1 %v2876_v0 }
 0x441   : > { %v2541_v20 = vpop.f32.mrb[40].mxu1 }
 0x442   : > { %v7713_v1 = vpop.f32.mrb[41].mxu1  ;;  %v2882_v32 = vsel %vm1543_vm4, %v2541_v20, -inf }
 0x443   : > { %2883 = vmax.xlane.f32.xlu0 %v2882_v32 }
 0x447   : > { %2886 = vmax.xlane.f32.xlu0 %v2885_v34 }
 0x449   : > { %v2705_v54 = vpop.f32.mrb[42].mxu1 }
 0x44a   : > { %v7727_v23 = vpop.f32.mrb[43].mxu1  ;;  %v2888_v5 = vsel %vm1543_vm4, %v2705_v54, -inf }
 0x44b   : > { %2892 = vmax.xlane.f32.xlu0 %v2891_v25  ;;  %2889 = vmax.xlane.f32.xlu1 %v2888_v5 }
 0x451   : > { %v2869_v22 = vpop.f32.mrb[44].mxu1 }
 0x452   : > { %v7741_v8 = vpop.f32.mrb[45].mxu1  ;;  %v2894_v37 = vsel %vm1543_vm4, %v2869_v22, -inf }
 0x453   : > { %2895 = vmax.xlane.f32.xlu1 %v2894_v37 }
 0x461   : > { %8409 = vrot.lane.b32.xlu0 %v9092_v4, %s8747_s19 }
 0x464   : > { %8414 = vrot.lane.b32.xlu1 %v9101_v57, %s8747_s19 }
 0x465   : > { %8429 = vrot.lane.b32.xlu0 %v9135_v29, %s8747_s19 }
 0x468   : > { %8419 = vrot.lane.b32.xlu1 %v9114_v12, %s8747_s19 }
 0x46c   : > { %8424 = vrot.lane.b32.xlu1 %v9125_v19, %s8747_s19 }
 0x470   : > { %8434 = vrot.lane.b32.xlu1 %v9145_v36, %s8747_s19 }
 0x48b   : > { %v2875_v18 = vpop.xlane.xlu0 %2874 }
 0x48c   : > { %v2897_v6 = vsub.f32 %v2295_v56, %v2875_v18 }
 0x48e   : > { %v2905_v26 = vmul.f32 1.442695, %v2897_v6 }
 0x490   : > { %8640 = vpow2.f32 %v2905_v26 }
 0x493   : > { %v2881_v21 = vpop.xlane.xlu0 %2880 }
 0x494   : > { %v2899_v51 = vsub.f32 %v2459_v11, %v2881_v21 }
 0x496   : > { %v2909_v9 = vmul.f32 1.442695, %v2899_v51 }
 0x498   : > { %8642 = vpow2.f32 %v2909_v9 }
 0x49a   : > { %v9382_v3 = vpop.eup %8640 }
 0x49b   : > { %v2921_v15 = vsel %vm1543_vm4, %v9382_v3, 0.0 }
 0x49c   : > { %2922 = vadd.xlane.f32.xlu0 %v2921_v15 }
 0x4a2   : > { %v9386_v28 = vpop.eup %8642 }
 0x4a3   : > { %v2927_v2 = vsel %vm1543_vm4, %v9386_v28, 0.0 }
 0x4a4   : > { %2928 = vadd.xlane.f32.xlu0 %v2927_v2 }
 0x4c8   : > { %v2878_v45 = vpop.xlane.xlu1 %2877 }
 0x4c9   : > { %v2898_v56 = vsub.f32 %v2377_v48, %v2878_v45 }
 0x4cb   : > { %v2907_v47 = vmul.f32 1.442695, %v2898_v56 }
 0x4cd   : > { %8644 = vpow2.f32 %v2907_v47 }
 0x4d0   : > { %v2884_v0 = vpop.xlane.xlu0 %2883 }
 0x4d1   : > { %v2900_v11 = vsub.f32 %v2541_v20, %v2884_v0 }
 0x4d3   : > { %v2911_v1 = vmul.f32 1.442695, %v2900_v11 }
 0x4d4   : > { %v2887_v32 = vpop.xlane.xlu0 %2886 }
 0x4d5   : > { %8646 = vpow2.f32 %v2911_v1  ;;  %v2901_v34 = vsub.f32 %v2623_v17, %v2887_v32 }
 0x4d7   : > { %v9390_v23 = vpop.eup %8644  ;;  %v2913_v25 = vmul.f32 1.442695, %v2901_v34 }
 0x4d8   : > { %v2893_v5 = vpop.xlane.xlu0 %2892  ;;  %v2890_v8 = vpop.xlane.xlu1 %2889  ;;  %v2924_v37 = vsel %vm1543_vm4, %v9390_v23, 0.0 }
 0x4d9   : > { %8648 = vpow2.f32 %v2913_v25  ;;  %v2903_v18 = vsub.f32 %v9359_v59, %v2893_v5  ;;  %v2902_v48 = vsub.f32 %v2705_v54, %v2890_v8  ;;  %2925 = vadd.xlane.f32.xlu1 %v2924_v37 }
 0x4db   : > { %v2917_v6 = vmul.f32 1.442695, %v2903_v18  ;;  %v2915_v26 = vmul.f32 1.442695, %v2902_v48 }
 0x4dc   : > { %v8410_v20 = vpop.permute.xlu0 %8409 }
 0x4dd   : > { %8650 = vpow2.f32 %v2917_v6  ;;  %v8412_v21 = vunpack.i.h.bf16 %v8410_v20  ;;  %v8411_v51 = vunpack.i.l.bf16 %v8410_v20 }
 0x4de   : > { %8652 = vpow2.f32 %v2915_v26 }
 0x4df   : > { %v9395_v17 = vpop.eup %8646  ;;  %v8191_v9 = vpack.c.bf16 %v8412_v21, %v8411_v51 }
 0x4e0   : > { %v2896_v15 = vpop.xlane.xlu1 %2895  ;;  %v2930_v2 = vsel %vm1543_vm4, %v9395_v17, 0.0  ;;  %v8430_v37 = vpop.permute.xlu0 %8429 }
 0x4e1   : > { %v2904_v45 = vsub.f32 %v2869_v22, %v2896_v15  ;;  %8192 = vmatpush3.bf16.msra.mxu0 %v8191_v9  ;;  %2931 = vadd.xlane.f32.xlu1 %v2930_v2  ;;  %v8432_v15 = vunpack.i.h.bf16 %v8430_v37  ;;  %v8431_v2 = vunpack.i.l.bf16 %v8430_v37 }
 0x4e2   : > { %8196 = vmatprep.subr.bf16.mxu0 %v8744_v42 }
 0x4e3   : > { %v9400_v59 = vpop.eup %8648  ;;  %v2919_v54 = vmul.f32 1.442695, %v2904_v45 }
 0x4e4   : > { %v8415_v56 = vpop.permute.xlu1 %8414  ;;  %v2933_v47 = vsel %vm1543_vm4, %v9400_v59, 0.0 }
 0x4e5   : > { %8654 = vpow2.f32 %v2919_v54  ;;  %v8417_v0 = vunpack.i.h.bf16 %v8415_v56  ;;  %v8416_v11 = vunpack.i.l.bf16 %v8415_v56  ;;  %2934 = vadd.xlane.f32.xlu0 %v2933_v47  ;;  %v8203_v56 = vpack.c.bf16 %v8432_v15, %v8431_v2 }
 0x4e7   : > { %v9404_v1 = vpop.eup %8650  ;;  %v8194_v32 = vpack.c.bf16 %v8417_v0, %v8416_v11 }
 0x4e8   : > { %v9406_v34 = vpop.eup %8652  ;;  %v2939_v22 = vsel %vm1543_vm4, %v9404_v1, 0.0  ;;  %v8420_v48 = vpop.permute.xlu1 %8419 }
 0x4e9   : > { %2940 = vadd.xlane.f32.xlu0 %v2939_v22  ;;  %v2936_v25 = vsel %vm1543_vm4, %v9406_v34, 0.0  ;;  %8195 = vmatpush3.bf16.msra.mxu1 %v8194_v32  ;;  %v8422_v26 = vunpack.i.h.bf16 %v8420_v48  ;;  %v8421_v20 = vunpack.i.l.bf16 %v8420_v48 }
 0x4ea   : > { %2937 = vadd.xlane.f32.xlu1 %v2936_v25  ;;  %8199 = vmatprep.subr.bf16.mxu1 %v8744_v42 }
 0x4eb   : > { %v8197_v9 = vpack.c.bf16 %v8422_v26, %v8421_v20 }
 0x4ef   : > { %v9413_v5 = vpop.eup %8654 }
 0x4f0   : > { %v2942_v8 = vsel %vm1543_vm4, %v9413_v5, 0.0 }
 0x4f1   : > { %2943 = vadd.xlane.f32.xlu1 %v2942_v8 }
 0x4ff   : > { %8439 = vrot.lane.b32.xlu0 %v9155_v46, %s8747_s19 }
 0x502   : > { %8444 = vrot.lane.b32.xlu1 %v9161_v53, %s8747_s19 }
 0x503   : > { %8449 = vrot.lane.b32.xlu0 %v8951_v62, %s8748_s20 }
 0x506   : > { %8454 = vrot.lane.b32.xlu1 %v8967_v7, %s8748_s20 }
 0x507   : > { %3869 = vrot.lane.b32.xlu0 %v8971_v10, %s8748_s20 }
 0x50a   : > { %8459 = vrot.lane.b32.xlu1 %v8978_v16, %s8748_s20 }
 0x50b   : > { %3951 = vrot.lane.b32.xlu0 %v9006_v30, %s8748_s20 }
 0x50e   : > { %8464 = vrot.lane.b32.xlu1 %v8996_v24, %s8748_s20 }
 0x50f   : > { %4033 = vrot.lane.b32.xlu0 %v9000_v27, %s8748_s20 }
 0x512   : > { %8469 = vrot.lane.b32.xlu1 %v9008_v33, %s8748_s20 }
 0x513   : > { %8474 = vrot.lane.b32.xlu0 %v9026_v39, %s8748_s20 }
 0x516   : > { %4115 = vrot.lane.b32.xlu1 %v9030_v40, %s8748_s20 }
 0x517   : > { %8479 = vrot.lane.b32.xlu0 %v9038_v55, %s8748_s20 }
 0x51a   : > { %8484 = vrot.lane.b32.xlu1 %v9056_v61, %s8748_s20 }
 0x51b   : > { %4197 = vrot.lane.b32.xlu0 %v9036_v52, %s8748_s20 }
 0x51e   : > { %4279 = vrot.lane.b32.xlu1 %v9060_v63, %s8748_s20 }
 0x51f   : > { %4361 = vrot.lane.b32.xlu0 %v9064_v50, %s8748_s20 }
 0x522   : > { %4443 = vrot.lane.b32.xlu1 %v9079_v44, %s8748_s20 }
 0x529   : > { %v2923_v18 = vpop.xlane.xlu0 %2922 }
 0x52a   : > { %8656 = vrcp.f32 %v2923_v18 }
 0x531   : > { %v2929_v6 = vpop.xlane.xlu0 %2928 }
 0x532   : > { %8658 = vrcp.f32 %v2929_v6 }
 0x534   : > { %v8657_v21 = vpop.eup %8656 }
 0x535   : > { %v2953_v51 = vmul.f32 %v8657_v21, %v9382_v3  ;;  %v8425_v3 = vpop.permute.xlu1 %8424 }
 0x536   : > { %v8427_v32 = vunpack.i.h.bf16 %v8425_v3  ;;  %v8426_v22 = vunpack.i.l.bf16 %v8425_v3 }
 0x537   : > { %7747 = vmatmul.mubr.msk.f32.vlgmr.msra.gmra.mrb[42].mxu0 %vm1543_vm4, %v2953_v51 }
 0x538   : > { %8198 = vmatpush3.bf16.msra.mxu0 %v8197_v9  ;;  %7760 = vmatprep.mubr.msk.f32.mxu0 %vm8745_vm1, %v8746_v43  ;;  %v8200_v37 = vpack.c.bf16 %v8427_v32, %v8426_v22 }
 0x539   : > { %8202 = vmatprep.subr.bf16.mxu0 %v8744_v42  ;;  %v8435_v47 = vpop.permute.xlu1 %8434 }
 0x53a   : > { %v8437_v48 = vunpack.i.h.bf16 %v8435_v47  ;;  %v8436_v6 = vunpack.i.l.bf16 %v8435_v47 }
 0x53c   : > { %v8659_v45 = vpop.eup %8658  ;;  %v8206_v51 = vpack.c.bf16 %v8437_v48, %v8436_v6 }
 0x53d   : > { %v2955_v54 = vmul.f32 %v8659_v45, %v9386_v28 }
 0x53f   : > { %7761 = vmatmul.mubr.msk.f32.vlgmr.msra.gmra.mrb[44].mxu0 %vm1543_vm4, %v2955_v54 }
 0x540   : > { %8204 = vmatpush3.bf16.msra.mxu0 %v8203_v56  ;;  %7774 = vmatprep.mubr.msk.f32.mxu0 %vm8745_vm1, %v8746_v43 }
 0x541   : > { %8208 = vmatprep.subr.bf16.mxu0 %v8744_v42 }
 0x566   : > { %v2926_v0 = vpop.xlane.xlu1 %2925 }
 0x567   : > { %8660 = vrcp.f32 %v2926_v0 }
 0x56e   : > { %v2932_v11 = vpop.xlane.xlu1 %2931 }
 0x56f   : > { %8662 = vrcp.f32 %v2932_v11 }
 0x571   : > { %v8661_v25 = vpop.eup %8660 }
 0x572   : > { %v2954_v28 = vmul.f32 %v8661_v25, %v9390_v23  ;;  %v2935_v8 = vpop.xlane.xlu0 %2934 }
 0x573   : > { %8664 = vrcp.f32 %v2935_v8 }
 0x574   : > { %7754 = vmatmul.mubr.msk.f32.vlgmr.msra.gmra.mrb[46].mxu1 %vm1543_vm4, %v2954_v28 }
 0x575   : > { %8201 = vmatpush3.bf16.msra.mxu1 %v8200_v37  ;;  %7767 = vmatprep.mubr.msk.f32.mxu1 %vm8745_vm1, %v8746_v43 }
 0x576   : > { %v2941_v18 = vpop.xlane.xlu0 %2940  ;;  %8205 = vmatprep.subr.bf16.mxu1 %v8744_v42 }
 0x577   : > { %8666 = vrcp.f32 %v2941_v18  ;;  %v2938_v26 = vpop.xlane.xlu1 %2937 }
 0x578   : > { %8668 = vrcp.f32 %v2938_v26  ;;  %v7108_v26 = vld [vmem:[%s9888_s8 + $0x8] sm:$0xff] }
 0x579   : > { %v8663_v20 = vpop.eup %8662 }
 0x57a   : > { %v2956_v23 = vmul.f32 %v8663_v20, %v9395_v17  ;;  %v8440_v21 = vpop.permute.xlu0 %8439 }
 0x57b   : > { %v8442_v9 = vunpack.i.h.bf16 %v8440_v21  ;;  %v8441_v15 = vunpack.i.l.bf16 %v8440_v21 }
 0x57c   : > { %7768 = vmatmul.mubr.msk.f32.vlgmr.msra.gmra.mrb[48].mxu1 %vm1543_vm4, %v2956_v23 }
 0x57d   : > { %v8665_v2 = vpop.eup %8664  ;;  %v8209_v45 = vpack.c.bf16 %v8442_v9, %v8441_v15  ;;  %8207 = vmatpush3.bf16.msra.mxu1 %v8206_v51  ;;  %7781 = vmatprep.mubr.msk.f32.mxu1 %vm8745_vm1, %v8746_v43 }
 0x57e   : > { %v2957_v54 = vmul.f32 %v8665_v2, %v9400_v59  ;;  %v2944_v56 = vpop.xlane.xlu1 %2943  ;;  %8211 = vmatprep.subr.bf16.mxu1 %v8744_v42  ;;  %v8450_v25 = vpop.permute.xlu0 %8449 }
 0x57f   : > { %8670 = vrcp.f32 %v2944_v56  ;;  %v8452_v8 = vunpack.i.h.bf16 %v8450_v25 }
 0x580   : > { %7775 = vmatmul.mubr.msk.f32.vlgmr.msra.gmra.mrb[46].mxu0 %vm1543_vm4, %v2957_v54 }
 0x581   : > { %v8667_v17 = vpop.eup %8666  ;;  %8210 = vmatpush3.bf16.msra.mxu0 %v8209_v45  ;;  %7788 = vmatprep.mubr.msk.f32.mxu0 %vm8745_vm1, %v8746_v43 }
 0x582   : > { %v8669_v3 = vpop.eup %8668  ;;  %v2959_v47 = vmul.f32 %v8667_v17, %v9404_v1  ;;  %v8445_v0 = vpop.permute.xlu1 %8444  ;;  %v8451_v1 = vunpack.i.l.bf16 %v8450_v25  ;;  %7798 = vmatprep.subr.mxu0 %v7108_v26 }
 0x583   : > { %v2958_v11 = vmul.f32 %v8669_v3, %v9406_v34  ;;  %v8447_v32 = vunpack.i.h.bf16 %v8445_v0  ;;  %v8446_v22 = vunpack.i.l.bf16 %v8445_v0 }
 0x584   : > { %7789 = vmatmul.mubr.msk.f32.vlgmr.msra.gmra.mrb[48].mxu0 %vm1543_vm4, %v2959_v47  ;;  %v8215_v34 = vpack.c.bf16 %v8452_v8, %v8451_v1 }
 0x585   : > { %v8212_v59 = vpack.c.bf16 %v8447_v32, %v8446_v22  ;;  %7782 = vmatmul.mubr.msk.f32.vlgmr.msra.gmra.mrb[50].mxu1 %vm1543_vm4, %v2958_v11  ;;  %7799 = vmatpush3.msra.mxu0 %v7108_v26 }
 0x586   : > { %7795 = vmatprep.mubr.msk.f32.mxu1 %vm8745_vm1, %v8746_v43  ;;  %v8455_v18 = vpop.permute.xlu1 %8454 }
 0x587   : > { %8213 = vmatpush3.bf16.msra.mxu1 %v8212_v59  ;;  %v8457_v48 = vunpack.i.h.bf16 %v8455_v18  ;;  %v8456_v6 = vunpack.i.l.bf16 %v8455_v18 }
 0x588   : > { %8214 = vmatprep.subr.bf16.mxu1 %v8744_v42 }
 0x589   : > { %v8671_v28 = vpop.eup %8670  ;;  %v8219_v20 = vpack.c.bf16 %v8457_v48, %v8456_v6 }
 0x58a   : > { %v2960_v37 = vmul.f32 %v8671_v28, %v9413_v5  ;;  %v3870_v5 = vpop.permute.xlu0 %3869  ;;  %v8460_v23 = vpop.permute.xlu1 %8459 }
 0x58b   : > { %v8462_v21 = vunpack.i.h.bf16 %v8460_v23  ;;  %v8461_v51 = vunpack.i.l.bf16 %v8460_v23 }
 0x58c   : > { %7796 = vmatmul.mubr.msk.f32.vlgmr.msra.gmra.mrb[52].mxu1 %vm1543_vm4, %v2960_v37 }
 0x58d   : > { %7830 = vmatprep.mubr.msk.f32.mxu1 %vm8745_vm1, %v8746_v43  ;;  %v8223_v2 = vpack.c.bf16 %v8462_v21, %v8461_v51 }
 0x58e   : > { %v3952_v9 = vpop.permute.xlu0 %3951  ;;  %v8465_v15 = vpop.permute.xlu1 %8464 }
 0x58f   : > { %v8467_v54 = vunpack.i.h.bf16 %v8465_v15  ;;  %v8466_v56 = vunpack.i.l.bf16 %v8465_v15 }
 0x590   : > { %8217 = vmatpush3.bf16.xpose.msk.msra.mxu1 %vm8945_vm3, %v8215_v34  ;;  %v2216_v34 = vld [vmem:[%s9888_s8] sm:$0xff] }
 0x591   : > { %8218 = vmatprep.subr.bf16.mxu1 %v8744_v42  ;;  %v8227_v3 = vpack.c.bf16 %v8467_v54, %v8466_v56  ;;  %7812 = vmatprep.subr.mxu0 %v2216_v34 }
 0x592   : > { %v4034_v45 = vpop.permute.xlu0 %4033  ;;  %v8470_v17 = vpop.permute.xlu1 %8469 }
 0x593   : > { %v8472_v56 = vunpack.i.h.bf16 %v8470_v17 }
 0x596   : > { %v8475_v47 = vpop.permute.xlu0 %8474  ;;  %v4116_v0 = vpop.permute.xlu1 %4115 }
 0x597   : > { %7831 = vmatmul.mubr.msk.f32.vlgmr.msra.gmra.mrb[54].mxu1 %vm910_vm2, %v3870_v5  ;;  %v8477_v11 = vunpack.i.h.bf16 %v8475_v47  ;;  %v8476_v32 = vunpack.i.l.bf16 %v8475_v47 }
 0x598   : > { %8221 = vmatpush3.bf16.xpose.msk.msra.mxu1 %vm8945_vm3, %v8219_v20  ;;  %7837 = vmatprep.mubr.msk.f32.mxu1 %vm8745_vm1, %v8746_v43 }
 0x599   : > { %8222 = vmatprep.subr.bf16.mxu1 %v8744_v42  ;;  %v8235_v22 = vpack.c.bf16 %v8477_v11, %v8476_v32 }
 0x59a   : > { %v8485_v59 = vpop.permute.xlu1 %8484  ;;  %v8480_v32 = vpop.permute.xlu0 %8479 }
 0x59b   : > { %v8487_v25 = vunpack.i.h.bf16 %v8485_v59  ;;  %v8486_v28 = vunpack.i.l.bf16 %v8485_v59 }
 0x59d   : > { %v8243_v8 = vpack.c.bf16 %v8487_v25, %v8486_v28 }
 0x59e   : > { %v4280_v1 = vpop.permute.xlu1 %4279  ;;  %v4198_v59 = vpop.permute.xlu0 %4197 }
 0x59f   : > { %7838 = vmatmul.mubr.msk.f32.vlgmr.msra.gmra.mrb[56].mxu1 %vm910_vm2, %v3952_v9 }
 0x5a0   : > { %8225 = vmatpush3.bf16.xpose.msk.msra.mxu1 %vm8945_vm3, %v8223_v2  ;;  %7844 = vmatprep.mubr.msk.f32.mxu1 %vm8745_vm1, %v8746_v43 }
 0x5a1   : > { %8226 = vmatprep.subr.bf16.mxu1 %v8744_v42 }
 0x5a2   : > { %v4444_v37 = vpop.permute.xlu1 %4443 }
 0x5a7   : > { %7845 = vmatmul.mubr.msk.f32.vlgmr.msra.gmra.mrb[58].mxu1 %vm910_vm2, %v4034_v45 }
 0x5a8   : > { %8229 = vmatpush3.bf16.xpose.msk.msra.mxu1 %vm8945_vm3, %v8227_v3  ;;  %7851 = vmatprep.mubr.msk.f32.mxu1 %vm8745_vm1, %v8746_v43  ;;  %v8471_v3 = vunpack.i.l.bf16 %v8470_v17 }
 0x5a9   : > { %8234 = vmatprep.subr.bf16.mxu1 %v8744_v42 }
 0x5aa   : > { %v8231_v11 = vpack.c.bf16 %v8472_v56, %v8471_v3 }
 0x5af   : > { %7852 = vmatmul.mubr.msk.f32.vlgmr.msra.gmra.mrb[60].mxu1 %vm910_vm2, %v4116_v0 }
 0x5b0   : > { %8237 = vmatpush3.bf16.xpose.msk.msra.mxu1 %vm8945_vm3, %v8235_v22  ;;  %7865 = vmatprep.mubr.msk.f32.mxu1 %vm8745_vm1, %v8746_v43  ;;  %v8481_v22 = vunpack.i.l.bf16 %v8480_v32 }
 0x5b1   : > { %8242 = vmatprep.subr.bf16.mxu1 %v8744_v42 }
 0x5b7   : > { %7866 = vmatmul.mubr.msk.f32.vlgmr.msra.gmra.mrb[62].mxu1 %vm910_vm2, %v4280_v1 }
 0x5b8   : > { %8245 = vmatpush3.bf16.xpose.msk.msra.mxu1 %vm8945_vm3, %v8243_v8  ;;  %7879 = vmatprep.mubr.msk.f32.mxu1 %vm8745_vm1, %v8746_v43 }
 0x5b9   : > { %8252 = vmatprep.subr.bf16.mxu1 %v8744_v42 }
 0x5bf   : > { %7880 = vmatmul.mubr.msk.f32.vlgmr.msra.gmra.mrb[64].mxu1 %vm910_vm2, %v4444_v37 }
 0x5c0   : > { %7900 = vmatprep.mubr.msk.f32.mxu1 %vm8745_vm1, %v8746_v43 }
 0x60a   : > { %v3038_v18 = vpop.f32.mrb[42].mxu0 }
 0x60b   : > { %v7748_v48 = vpop.f32.mrb[43].mxu0  ;;  %7800 = vmatprep.mubr.msk.f32.mxu0 %vm910_vm2, %v3038_v18 }
 0x612   : > { %v3200_v6 = vpop.f32.mrb[44].mxu0 }
 0x613   : > { %v7762_v26 = vpop.f32.mrb[45].mxu0 }
 0x647   : > { %v3119_v5 = vpop.f32.mrb[46].mxu1 }
 0x648   : > { %v7755_v20 = vpop.f32.mrb[47].mxu1  ;;  %7801 = vmatmul.mubr.msk.f32.vlgmr.msra.gmra.mrb[50].mxu0 %vm910_vm2, %v3119_v5 }
 0x649   : > { %7803 = vmatprep.mubr.msk.f32.mxu0 %vm910_vm2, %v3200_v6  ;;  %7813 = vmatpush3.msra.mxu0 %v2216_v34 }
 0x64a   : > { %8230 = vmatprep.subr.bf16.mxu0 %v8744_v42 }
 0x64f   : > { %v3281_v23 = vpop.f32.mrb[48].mxu1 }
 0x650   : > { %v7769_v21 = vpop.f32.mrb[49].mxu1  ;;  %7804 = vmatmul.mubr.msk.f32.gmra.mrb[52].mxu0 %vm910_vm2, %v3281_v23 }
 0x653   : > { %v3362_v51 = vpop.f32.mrb[46].mxu0 }
 0x654   : > { %v7776_v9 = vpop.f32.mrb[47].mxu0  ;;  %7806 = vmatprep.mubr.msk.f32.mxu0 %vm910_vm2, %v3362_v51 }
 0x657   : > { %v3524_v15 = vpop.f32.mrb[48].mxu0 }
 0x658   : > { %v3443_v2 = vpop.f32.mrb[50].mxu1  ;;  %v7790_v45 = vpop.f32.mrb[49].mxu0 }
 0x659   : > { %v7783_v54 = vpop.f32.mrb[51].mxu1  ;;  %7807 = vmatmul.mubr.msk.f32.gmra.mrb[54].mxu0 %vm910_vm2, %v3443_v2 }
 0x65a   : > { %7809 = vmatprep.mubr.msk.f32.mxu0 %vm910_vm2, %v3524_v15 }
 0x65f   : > { %v3605_v47 = vpop.f32.mrb[52].mxu1 }
 0x660   : > { %v7797_v0 = vpop.f32.mrb[53].mxu1  ;;  %7810 = vmatmul.mubr.msk.f32.gmra.mrb[56].mxu0 %vm910_vm2, %v3605_v47 }
 0x661   : > { %7814 = vmatprep.mubr.msk.f32.mxu0 %vm910_vm2, %v9343_v35 }
 0x664   : > { %7815 = vmatmul.mubr.msk.f32.vlgmr.msra.gmra.mrb[50].mxu0 %vm910_vm2, %v9347_v49 }
 0x665   : > { %8233 = vmatpush3.bf16.xpose.msk.msra.mxu0 %vm8945_vm3, %v8231_v11  ;;  %7817 = vmatprep.mubr.msk.f32.mxu0 %vm910_vm2, %v9345_v31  ;;  %v8482_v31 = vunpack.i.h.bf16 %v8480_v32 }
 0x666   : > { %8238 = vmatprep.subr.bf16.mxu0 %v8744_v42 }
 0x668   : > { %7818 = vmatmul.mubr.msk.f32.gmra.mrb[52].mxu0 %vm910_vm2, %v9351_v13  ;;  %v8239_v13 = vpack.c.bf16 %v8482_v31, %v8481_v22 }
 0x669   : > { %7820 = vmatprep.mubr.msk.f32.mxu0 %vm910_vm2, %v9349_v38 }
 0x66a   : > { %v9552_v17 = vpop.f32.mrb[54].mxu1 }
 0x66b   : > { %v7832_v35 = vpop.f32.mrb[55].mxu1  ;;  %v4525_v49 = vsel %vm1543_vm4, %v9552_v17, -inf }
 0x66c   : > { %7821 = vmatmul.mubr.msk.f32.gmra.mrb[54].mxu0 %vm910_vm2, %v9355_v14  ;;  %4526 = vmax.xlane.f32.xlu0 %v4525_v49  ;;  %v4362_v14 = vpop.permute.xlu0 %4361 }
 0x66d   : > { %7823 = vmatprep.mubr.msk.f32.mxu0 %vm910_vm2, %v9353_v41 }
 0x670   : > { %7824 = vmatmul.mubr.msk.f32.gmra.mrb[56].mxu0 %vm910_vm2, %v9361_v60 }
 0x671   : > { %7858 = vmatprep.mubr.msk.f32.mxu0 %vm8745_vm1, %v8746_v43 }
 0x672   : > { %v4029_v38 = vpop.f32.mrb[56].mxu1 }
 0x673   : > { %v7839_v25 = vpop.f32.mrb[57].mxu1  ;;  %v4528_v28 = vsel %vm1543_vm4, %v4029_v38, -inf }
 0x674   : > { %7859 = vmatmul.mubr.msk.f32.vlgmr.msra.gmra.mrb[58].mxu0 %vm910_vm2, %v4198_v59  ;;  %4529 = vmax.xlane.f32.xlu1 %v4528_v28 }
 0x675   : > { %8241 = vmatpush3.bf16.xpose.msk.msra.mxu0 %vm8945_vm3, %v8239_v13  ;;  %7872 = vmatprep.mubr.msk.f32.mxu0 %vm8745_vm1, %v8746_v43 }
 0x676   : > { %8246 = vmatprep.subr.bf16.mxu0 %v8744_v42 }
 0x67a   : > { %v4111_v41 = vpop.f32.mrb[58].mxu1 }
 0x67b   : > { %v7846_v60 = vpop.f32.mrb[59].mxu1  ;;  %v4531_v8 = vsel %vm1543_vm4, %v4111_v41, -inf }
 0x67c   : > { %7873 = vmatmul.mubr.msk.f32.vlgmr.msra.gmra.mrb[60].mxu0 %vm910_vm2, %v4362_v14  ;;  %4532 = vmax.xlane.f32.xlu0 %v4531_v8 }
 0x67d   : > { %7886 = vmatprep.mubr.msk.f32.mxu0 %vm8745_vm1, %v8746_v43 }
 0x682   : > { %v4193_v1 = vpop.f32.mrb[60].mxu1 }
 0x683   : > { %v7853_v37 = vpop.f32.mrb[61].mxu1  ;;  %v4534_v34 = vsel %vm1543_vm4, %v4193_v1, -inf }
 0x684   : > { %4535 = vmax.xlane.f32.xlu0 %v4534_v34 }
 0x68a   : > { %v4357_v18 = vpop.f32.mrb[62].mxu1 }
 0x68b   : > { %v7867_v48 = vpop.f32.mrb[63].mxu1  ;;  %v4540_v6 = vsel %vm1543_vm4, %v4357_v18, -inf }
 0x68c   : > { %4541 = vmax.xlane.f32.xlu1 %v4540_v6 }
 0x692   : > { %v4521_v26 = vpop.f32.mrb[64].mxu1 }
 0x693   : > { %v7881_v5 = vpop.f32.mrb[65].mxu1  ;;  %v4546_v20 = vsel %vm1543_vm4, %v4521_v26, -inf }
 0x694   : > { %4547 = vmax.xlane.f32.xlu1 %v4546_v20 }
 0x6f9   : > { %v4527_v9 = vpop.xlane.xlu0 %4526 }
 0x6fa   : > { %v4549_v28 = vsub.f32 %v9552_v17, %v4527_v9 }
 0x6fc   : > { %v4557_v14 = vmul.f32 1.442695, %v4549_v28 }
 0x701   : > { %v4530_v23 = vpop.xlane.xlu1 %4529 }
 0x702   : > { %v4550_v21 = vsub.f32 %v4029_v38, %v4530_v23 }
 0x704   : > { %v4559_v51 = vmul.f32 1.442695, %v4550_v21 }
 0x706   : > { %8672 = vpow2.f32 %v4559_v51 }
 0x709   : > { %v4533_v15 = vpop.xlane.xlu0 %4532 }
 0x70a   : > { %v4551_v60 = vsub.f32 %v4111_v41, %v4533_v15 }
 0x70c   : > { %v4561_v8 = vmul.f32 1.442695, %v4551_v60 }
 0x710   : > { %v9578_v2 = vpop.eup %8672 }
 0x711   : > { %v4536_v45 = vpop.xlane.xlu0 %4535  ;;  %v4576_v54 = vsel %vm1543_vm4, %v9578_v2, 0.0 }
 0x712   : > { %v4552_v56 = vsub.f32 %v4193_v1, %v4536_v45  ;;  %4577 = vadd.xlane.f32.xlu1 %v4576_v54 }
 0x714   : > { %v4563_v3 = vmul.f32 1.442695, %v4552_v56 }
 0x716   : > { %8674 = vpow2.f32 %v4563_v3 }
 0x719   : > { %v4542_v47 = vpop.xlane.xlu1 %4541 }
 0x71a   : > { %v4554_v0 = vsub.f32 %v4357_v18, %v4542_v47 }
 0x71c   : > { %v4567_v11 = vmul.f32 1.442695, %v4554_v0 }
 0x71e   : > { %8676 = vpow2.f32 %v4567_v11 }
 0x720   : > { %v9582_v35 = vpop.eup %8674 }
 0x721   : > { %v4548_v49 = vpop.xlane.xlu1 %4547  ;;  %v4582_v32 = vsel %vm1543_vm4, %v9582_v35, 0.0 }
 0x722   : > { %v4556_v31 = vsub.f32 %v4521_v26, %v4548_v49  ;;  %4583 = vadd.xlane.f32.xlu1 %v4582_v32 }
 0x724   : > { %v4571_v22 = vmul.f32 1.442695, %v4556_v31 }
 0x726   : > { %8678 = vpow2.f32 %v4571_v22 }
 0x727   : > { %8680 = vpow2.f32 %v4557_v14 }
 0x728   : > { %v9586_v38 = vpop.eup %8676  ;;  %8682 = vpow2.f32 %v4561_v8 }
 0x729   : > { %v4588_v13 = vsel %vm1543_vm4, %v9586_v38, 0.0 }
 0x72a   : > { %4589 = vadd.xlane.f32.xlu1 %v4588_v13 }
 0x730   : > { %v9590_v59 = vpop.eup %8678 }
 0x731   : > { %v4594_v25 = vsel %vm1543_vm4, %v9590_v59, 0.0  ;;  %v9605_v48 = vpop.eup %8680 }
 0x732   : > { %4595 = vadd.xlane.f32.xlu1 %v4594_v25  ;;  %v4573_v6 = vsel %vm1543_vm4, %v9605_v48, 0.0  ;;  %v9611_v26 = vpop.eup %8682 }
 0x733   : > { %v4579_v5 = vsel %vm1543_vm4, %v9611_v26, 0.0 }
 0x743   : > { %8494 = vrot.lane.b32.xlu1 %v9101_v57, %s8748_s20 }
 0x747   : > { %v4275_v1 = vpop.f32.mrb[58].mxu0  ;;  %8499 = vrot.lane.b32.xlu1 %v9114_v12, %s8748_s20 }
 0x748   : > { %v7860_v37 = vpop.f32.mrb[59].mxu0  ;;  %v4537_v34 = vsel %vm1543_vm4, %v4275_v1, -inf }
 0x749   : > { %4538 = vmax.xlane.f32.xlu0 %v4537_v34 }
 0x74b   : > { %8504 = vrot.lane.b32.xlu1 %v9125_v19, %s8748_s20 }
 0x74f   : > { %v4439_v17 = vpop.f32.mrb[60].mxu0  ;;  %8514 = vrot.lane.b32.xlu1 %v9145_v36, %s8748_s20 }
 0x750   : > { %v7874_v41 = vpop.f32.mrb[61].mxu0  ;;  %v4543_v18 = vsel %vm1543_vm4, %v4439_v17, -inf }
 0x751   : > { %4544 = vmax.xlane.f32.xlu0 %v4543_v18 }
 0x753   : > { %8524 = vrot.lane.b32.xlu1 %v9161_v53, %s8748_s20 }
 0x755   : > { %4574 = vadd.xlane.f32.xlu0 %v4573_v6 }
 0x757   : > { %8534 = vrot.lane.b32.xlu1 %v8967_v7, %s8749_s27 }
 0x759   : > { %4580 = vadd.xlane.f32.xlu0 %v4579_v5 }
 0x75b   : > { %8539 = vrot.lane.b32.xlu1 %v8978_v16, %s8749_s27 }
 0x75f   : > { %5466 = vrot.lane.b32.xlu1 %v9006_v30, %s8749_s27 }
 0x763   : > { %8554 = vrot.lane.b32.xlu1 %v9026_v39, %s8749_s27 }
 0x767   : > { %5630 = vrot.lane.b32.xlu1 %v9030_v40, %s8749_s27 }
 0x76b   : > { %8564 = vrot.lane.b32.xlu1 %v9056_v61, %s8749_s27 }
 0x76f   : > { %8489 = vrot.lane.b32.xlu0 %v9092_v4, %s8748_s20  ;;  %5794 = vrot.lane.b32.xlu1 %v9060_v63, %s8749_s27 }
 0x773   : > { %8509 = vrot.lane.b32.xlu0 %v9135_v29, %s8748_s20  ;;  %5958 = vrot.lane.b32.xlu1 %v9079_v44, %s8749_s27 }
 0x79f   : > { %v4578_v7 = vpop.xlane.xlu1 %4577 }
 0x7af   : > { %v4584_v16 = vpop.xlane.xlu1 %4583 }
 0x7b7   : > { %v4590_v30 = vpop.xlane.xlu1 %4589 }
 0x7bf   : > { %v4596_v39 = vpop.xlane.xlu1 %4595 }
 0x7c3   : > { %v8495_v40 = vpop.permute.xlu1 %8494 }
 0x7c4   : > { %v8497_v22 = vunpack.i.h.bf16 %v8495_v40  ;;  %v8496_v13 = vunpack.i.l.bf16 %v8495_v40 }
 0x7c6   : > { %v8250_v18 = vpack.c.bf16 %v8497_v22, %v8496_v13 }
 0x7c7   : > { %v8500_v20 = vpop.permute.xlu1 %8499 }
 0x7c8   : > { %v8502_v23 = vunpack.i.h.bf16 %v8500_v20  ;;  %v8501_v61 = vunpack.i.l.bf16 %v8500_v20 }
 0x7ca   : > { %v8253_v21 = vpack.c.bf16 %v8502_v23, %v8501_v61 }
 0x7cb   : > { %v8505_v0 = vpop.permute.xlu1 %8504 }
 0x7cc   : > { %8254 = vmatpush3.bf16.msra.mxu1 %v8253_v21  ;;  %v8507_v6 = vunpack.i.h.bf16 %v8505_v0  ;;  %v8506_v5 = vunpack.i.l.bf16 %v8505_v0 }
 0x7cd   : > { %8258 = vmatprep.subr.bf16.mxu1 %v8744_v42 }
 0x7ce   : > { %v8256_v40 = vpack.c.bf16 %v8507_v6, %v8506_v5 }
 0x7cf   : > { %v8515_v34 = vpop.permute.xlu1 %8514 }
 0x7d0   : > { %v8517_v20 = vunpack.i.h.bf16 %v8515_v34  ;;  %v8516_v23 = vunpack.i.l.bf16 %v8515_v34 }
 0x7d2   : > { %v8262_v61 = vpack.c.bf16 %v8517_v20, %v8516_v23 }
 0x7d6   : > { %v4539_v51 = vpop.xlane.xlu0 %4538 }
 0x7d7   : > { %v4553_v63 = vsub.f32 %v4275_v1, %v4539_v51 }
 0x7d9   : > { %v4565_v9 = vmul.f32 1.442695, %v4553_v63 }
 0x7db   : > { %8684 = vpow2.f32 %v4565_v9 }
 0x7de   : > { %v4545_v15 = vpop.xlane.xlu0 %4544 }
 0x7df   : > { %v4555_v45 = vsub.f32 %v4439_v17, %v4545_v15 }
 0x7e1   : > { %v4569_v54 = vmul.f32 1.442695, %v4555_v45 }
 0x7e2   : > { %v4575_v44 = vpop.xlane.xlu0 %4574 }
 0x7e3   : > { %8686 = vpow2.f32 %v4569_v54 }
 0x7e4   : > { %8688 = vrcp.f32 %v4575_v44 }
 0x7e5   : > { %v9636_v56 = vpop.eup %8684  ;;  %8690 = vrcp.f32 %v4578_v7 }
 0x7e6   : > { %v4581_v3 = vpop.xlane.xlu0 %4580  ;;  %v4585_v47 = vsel %vm1543_vm4, %v9636_v56, 0.0 }
 0x7e7   : > { %8692 = vrcp.f32 %v4581_v3  ;;  %4586 = vadd.xlane.f32.xlu0 %v4585_v47 }
 0x7e8   : > { %8694 = vrcp.f32 %v4584_v16 }
 0x7e9   : > { %8696 = vrcp.f32 %v4590_v30 }
 0x7ea   : > { %v8490_v11 = vpop.permute.xlu0 %8489  ;;  %8698 = vrcp.f32 %v4596_v39 }
 0x7eb   : > { %v8492_v49 = vunpack.i.h.bf16 %v8490_v11  ;;  %v8491_v32 = vunpack.i.l.bf16 %v8490_v11 }
 0x7ed   : > { %v9640_v31 = vpop.eup %8686  ;;  %v8247_v25 = vpack.c.bf16 %v8492_v49, %v8491_v32 }
 0x7ee   : > { %v8689_v28 = vpop.eup %8688  ;;  %v8510_v14 = vpop.permute.xlu0 %8509  ;;  %v4591_v60 = vsel %vm1543_vm4, %v9640_v31, 0.0 }
 0x7ef   : > { %v8512_v8 = vunpack.i.h.bf16 %v8510_v14  ;;  %v8511_v1 = vunpack.i.l.bf16 %v8510_v14  ;;  %4592 = vadd.xlane.f32.xlu0 %v4591_v60  ;;  %8248 = vmatpush3.bf16.msra.mxu0 %v8247_v25  ;;  %v8691_v37 = vpop.eup %8690  ;;  %v4605_v17 = vmul.f32 %v8689_v28, %v9605_v48 }
 0x7f0   : > { %8249 = vmatprep.subr.bf16.mxu0 %v8744_v42  ;;  %v4606_v30 = vmul.f32 %v8691_v37, %v9578_v2 }
 0x7f1   : > { %v8693_v41 = vpop.eup %8692  ;;  %v8259_v7 = vpack.c.bf16 %v8512_v8, %v8511_v1 }
 0x7f2   : > { %v4607_v16 = vmul.f32 %v8693_v41, %v9611_v26  ;;  %7887 = vmatmul.mubr.msk.f32.vlgmr.msra.gmra.mrb[62].mxu0 %vm1543_vm4, %v4605_v17  ;;  %v8695_v48 = vpop.eup %8694  ;;  %v8525_v26 = vpop.permute.xlu1 %8524 }
 0x7f3   : > { %8251 = vmatpush3.bf16.msra.mxu0 %v8250_v18  ;;  %7893 = vmatprep.mubr.msk.f32.mxu0 %vm8745_vm1, %v8746_v43  ;;  %v4608_v2 = vmul.f32 %v8695_v48, %v9582_v35  ;;  %v8697_v39 = vpop.eup %8696  ;;  %v8527_v21 = vunpack.i.h.bf16 %v8525_v26  ;;  %v8526_v51 = vunpack.i.l.bf16 %v8525_v26 }
 0x7f4   : > { %7901 = vmatmul.mubr.msk.f32.vlgmr.msra.gmra.mrb[66].mxu1 %vm1543_vm4, %v4607_v16  ;;  %8255 = vmatprep.subr.bf16.mxu0 %v8744_v42  ;;  %v4610_v63 = vmul.f32 %v8697_v39, %v9586_v38  ;;  %v8699_v9 = vpop.eup %8698 }
 0x7f5   : > { %8260 = vmatpush3.bf16.msra.mxu1 %v8259_v7  ;;  %7914 = vmatprep.mubr.msk.f32.mxu1 %vm8745_vm1, %v8746_v43  ;;  %v8268_v15 = vpack.c.bf16 %v8527_v21, %v8526_v51  ;;  %v4612_v35 = vmul.f32 %v8699_v9, %v9590_v59 }
 0x7f6   : > { %7894 = vmatmul.mubr.msk.f32.vlgmr.msra.gmra.mrb[64].mxu0 %vm1543_vm4, %v4606_v30  ;;  %8264 = vmatprep.subr.bf16.mxu1 %v8744_v42  ;;  %v8535_v54 = vpop.permute.xlu1 %8534 }
 0x7f7   : > { %8257 = vmatpush3.bf16.msra.mxu0 %v8256_v40  ;;  %7907 = vmatprep.mubr.msk.f32.mxu0 %vm8745_vm1, %v8746_v43  ;;  %v8537_v49 = vunpack.i.h.bf16 %v8535_v54  ;;  %v8536_v32 = vunpack.i.l.bf16 %v8535_v54 }
 0x7f8   : > { %8261 = vmatprep.subr.bf16.mxu0 %v8744_v42 }
 0x7f9   : > { %v8275_v13 = vpack.c.bf16 %v8537_v49, %v8536_v32 }
 0x7fa   : > { %7908 = vmatmul.mubr.msk.f32.vlgmr.msra.gmra.mrb[66].mxu0 %vm1543_vm4, %v4608_v2  ;;  %v8540_v0 = vpop.permute.xlu1 %8539 }
 0x7fb   : > { %8263 = vmatpush3.bf16.msra.mxu0 %v8262_v61  ;;  %7921 = vmatprep.mubr.msk.f32.mxu0 %vm8745_vm1, %v8746_v43  ;;  %v8542_v16 = vunpack.i.h.bf16 %v8540_v0  ;;  %v8541_v30 = vunpack.i.l.bf16 %v8540_v0 }
 0x7fc   : > { %8267 = vmatprep.subr.bf16.mxu0 %v8744_v42 }
 0x7fd   : > { %v8279_v26 = vpack.c.bf16 %v8542_v16, %v8541_v30 }
 0x7fe   : > { %7922 = vmatmul.mubr.msk.f32.vlgmr.msra.gmra.mrb[68].mxu0 %vm1543_vm4, %v4610_v63  ;;  %v5467_v22 = vpop.permute.xlu1 %5466 }
 0x7ff   : > { %8269 = vmatpush3.bf16.msra.mxu0 %v8268_v15  ;;  %7935 = vmatprep.mubr.msk.f32.mxu0 %vm8745_vm1, %v8746_v43 }
 0x802   : > { %7936 = vmatmul.mubr.msk.f32.vlgmr.msra.gmra.mrb[70].mxu0 %vm1543_vm4, %v4612_v35  ;;  %v8555_v14 = vpop.permute.xlu1 %8554 }
 0x803   : > { %v8557_v1 = vunpack.i.h.bf16 %v8555_v14  ;;  %v8556_v37 = vunpack.i.l.bf16 %v8555_v14 }
 0x805   : > { %8519 = vrot.lane.b32.xlu0 %v9155_v46, %s8748_s20  ;;  %v8291_v34 = vpack.c.bf16 %v8557_v1, %v8556_v37 }
 0x806   : > { %v5631_v8 = vpop.permute.xlu1 %5630 }
 0x809   : > { %8529 = vrot.lane.b32.xlu0 %v8951_v62, %s8749_s27  ;;  %v7157_v62 = vld [vmem:[%s9888_s8 + $0x10] sm:$0xff] }
 0x80a   : > { %7938 = vmatprep.subr.mxu0 %v7157_v62  ;;  %v8565_v17 = vpop.permute.xlu1 %8564 }
 0x80b   : > { %7939 = vmatpush3.msra.mxu0 %v7157_v62  ;;  %v8567_v41 = vunpack.i.h.bf16 %v8565_v17  ;;  %v8566_v18 = vunpack.i.l.bf16 %v8565_v17 }
 0x80c   : > { %8278 = vmatprep.subr.bf16.mxu0 %v8744_v42 }
 0x80d   : > { %5384 = vrot.lane.b32.xlu0 %v8971_v10, %s8749_s27  ;;  %v8299_v6 = vpack.c.bf16 %v8567_v41, %v8566_v18 }
 0x80e   : > { %v5795_v5 = vpop.permute.xlu1 %5794 }
 0x811   : > { %8544 = vrot.lane.b32.xlu0 %v8996_v24, %s8749_s27 }
 0x812   : > { %v5959_v7 = vpop.permute.xlu1 %5958 }
 0x815   : > { %8549 = vrot.lane.b32.xlu0 %v9008_v33, %s8749_s27 }
 0x819   : > { %5548 = vrot.lane.b32.xlu0 %v9000_v27, %s8749_s27 }
 0x81d   : > { %8559 = vrot.lane.b32.xlu0 %v9038_v55, %s8749_s27 }
 0x821   : > { %5712 = vrot.lane.b32.xlu0 %v9036_v52, %s8749_s27 }
 0x825   : > { %5876 = vrot.lane.b32.xlu0 %v9064_v50, %s8749_s27 }
 0x874   : > { %v4587_v10 = vpop.xlane.xlu0 %4586 }
 0x875   : > { %8700 = vrcp.f32 %v4587_v10 }
 0x87c   : > { %v4593_v24 = vpop.xlane.xlu0 %4592 }
 0x87d   : > { %8702 = vrcp.f32 %v4593_v24 }
 0x87f   : > { %v8701_v27 = vpop.eup %8700 }
 0x880   : > { %v4609_v33 = vmul.f32 %v8701_v27, %v9636_v56  ;;  %v8520_v55 = vpop.permute.xlu0 %8519 }
 0x881   : > { %v8522_v52 = vunpack.i.h.bf16 %v8520_v55  ;;  %v8521_v38 = vunpack.i.l.bf16 %v8520_v55 }
 0x882   : > { %7915 = vmatmul.mubr.msk.f32.vlgmr.msra.gmra.mrb[68].mxu1 %vm1543_vm4, %v4609_v33 }
 0x883   : > { %v8265_v50 = vpack.c.bf16 %v8522_v52, %v8521_v38  ;;  %7928 = vmatprep.mubr.msk.f32.mxu1 %vm8745_vm1, %v8746_v43 }
 0x884   : > { %v8530_v59 = vpop.permute.xlu0 %8529 }
 0x885   : > { %8266 = vmatpush3.bf16.msra.mxu1 %v8265_v50  ;;  %v8532_v3 = vunpack.i.h.bf16 %v8530_v59  ;;  %v8531_v47 = vunpack.i.l.bf16 %v8530_v59 }
 0x886   : > { %8270 = vmatprep.subr.bf16.mxu1 %v8744_v42 }
 0x887   : > { %v8703_v45 = vpop.eup %8702  ;;  %v8271_v56 = vpack.c.bf16 %v8532_v3, %v8531_v47 }
 0x888   : > { %v4611_v44 = vmul.f32 %v8703_v45, %v9640_v31  ;;  %v5385_v11 = vpop.permute.xlu0 %5384 }
 0x88a   : > { %7929 = vmatmul.mubr.msk.f32.vlgmr.msra.gmra.mrb[70].mxu1 %vm1543_vm4, %v4611_v44 }
 0x88b   : > { %7956 = vmatprep.mubr.msk.f32.mxu1 %vm8745_vm1, %v8746_v43 }
 0x88c   : > { %v8545_v31 = vpop.permute.xlu0 %8544 }
 0x88d   : > { %v8547_v25 = vunpack.i.h.bf16 %v8545_v31  ;;  %v8546_v28 = vunpack.i.l.bf16 %v8545_v31 }
 0x88e   : > { %8273 = vmatpush3.bf16.xpose.msk.msra.mxu1 %vm8945_vm3, %v8271_v56 }
 0x88f   : > { %8274 = vmatprep.subr.bf16.mxu1 %v8744_v42  ;;  %v8283_v60 = vpack.c.bf16 %v8547_v25, %v8546_v28 }
 0x890   : > { %v8550_v10 = vpop.permute.xlu0 %8549 }
 0x891   : > { %v8552_v33 = vunpack.i.h.bf16 %v8550_v10  ;;  %v8551_v55 = vunpack.i.l.bf16 %v8550_v10 }
 0x893   : > { %v8287_v38 = vpack.c.bf16 %v8552_v33, %v8551_v55 }
 0x894   : > { %v5549_v24 = vpop.permute.xlu0 %5548 }
 0x895   : > { %7957 = vmatmul.mubr.msk.f32.vlgmr.msra.gmra.mrb[72].mxu1 %vm910_vm2, %v5385_v11 }
 0x896   : > { %8277 = vmatpush3.bf16.xpose.msk.msra.mxu1 %vm8945_vm3, %v8275_v13  ;;  %7963 = vmatprep.mubr.msk.f32.mxu1 %vm8745_vm1, %v8746_v43 }
 0x897   : > { %8282 = vmatprep.subr.bf16.mxu1 %v8744_v42 }
 0x898   : > { %v8560_v50 = vpop.permute.xlu0 %8559 }
 0x899   : > { %v8562_v59 = vunpack.i.h.bf16 %v8560_v50  ;;  %v8561_v45 = vunpack.i.l.bf16 %v8560_v50 }
 0x89b   : > { %v8295_v47 = vpack.c.bf16 %v8562_v59, %v8561_v45 }
 0x89c   : > { %v5713_v56 = vpop.permute.xlu0 %5712 }
 0x89d   : > { %7964 = vmatmul.mubr.msk.f32.vlgmr.msra.gmra.mrb[74].mxu1 %vm910_vm2, %v5467_v22 }
 0x89e   : > { %8285 = vmatpush3.bf16.xpose.msk.msra.mxu1 %vm8945_vm3, %v8283_v60  ;;  %7977 = vmatprep.mubr.msk.f32.mxu1 %vm8745_vm1, %v8746_v43 }
 0x89f   : > { %8290 = vmatprep.subr.bf16.mxu1 %v8744_v42 }
 0x8a0   : > { %v5877_v32 = vpop.permute.xlu0 %5876 }
 0x8a5   : > { %7978 = vmatmul.mubr.msk.f32.vlgmr.msra.gmra.mrb[76].mxu1 %vm910_vm2, %v5631_v8 }
 0x8a6   : > { %8293 = vmatpush3.bf16.xpose.msk.msra.mxu1 %vm8945_vm3, %v8291_v34  ;;  %7991 = vmatprep.mubr.msk.f32.mxu1 %vm8745_vm1, %v8746_v43 }
 0x8a7   : > { %8298 = vmatprep.subr.bf16.mxu1 %v8744_v42 }
 0x8ad   : > { %7992 = vmatmul.mubr.msk.f32.vlgmr.msra.gmra.mrb[78].mxu1 %vm910_vm2, %v5795_v5 }
 0x8ae   : > { %8301 = vmatpush3.bf16.xpose.msk.msra.mxu1 %vm8945_vm3, %v8299_v6  ;;  %8005 = vmatprep.mubr.msk.f32.mxu1 %vm8745_vm1, %v8746_v43 }
 0x8af   : > { %8305 = vmatprep.subr.bf16.mxu1 %v8744_v42 }
 0x8b5   : > { %8006 = vmatmul.mubr.msk.f32.vlgmr.msra.gmra.mrb[80].mxu1 %vm910_vm2, %v5959_v7 }
 0x8b6   : > { %8019 = vmatprep.mubr.msk.f32.mxu1 %vm8745_vm1, %v8746_v43 }
 0x8c5   : > { %v4688_v48 = vpop.f32.mrb[62].mxu0 }
 0x8c6   : > { %v7888_v40 = vpop.f32.mrb[63].mxu0  ;;  %7940 = vmatprep.mubr.msk.f32.mxu0 %vm910_vm2, %v4688_v48 }
 0x8c7   : > { %v4846_v20 = vpop.f32.mrb[66].mxu1 }
 0x8c8   : > { %v7902_v23 = vpop.f32.mrb[67].mxu1 }
 0x8c9   : > { %v4767_v2 = vpop.f32.mrb[64].mxu0 }
 0x8ca   : > { %v7895_v39 = vpop.f32.mrb[65].mxu0  ;;  %7941 = vmatmul.mubr.msk.f32.vlgmr.msra.gmra.mrb[50].mxu0 %vm910_vm2, %v4767_v2 }
 0x8cb   : > { %8281 = vmatpush3.bf16.xpose.msk.msra.mxu0 %vm8945_vm3, %v8279_v26  ;;  %7943 = vmatprep.mubr.msk.f32.mxu0 %vm910_vm2, %v4846_v20 }
 0x8cc   : > { %8286 = vmatprep.subr.bf16.mxu0 %v8744_v42 }
 0x8cd   : > { %v4925_v61 = vpop.f32.mrb[66].mxu0 }
 0x8ce   : > { %v7909_v21 = vpop.f32.mrb[67].mxu0  ;;  %7944 = vmatmul.mubr.msk.f32.gmra.mrb[52].mxu0 %vm910_vm2, %v4925_v61 }
 0x8d1   : > { %v5083_v51 = vpop.f32.mrb[68].mxu0 }
 0x8d2   : > { %v7923_v63 = vpop.f32.mrb[69].mxu0 }
 0x8d5   : > { %v5241_v9 = vpop.f32.mrb[70].mxu0 }
 0x8d6   : > { %v7937_v15 = vpop.f32.mrb[71].mxu0 }
 0x955   : > { %v5004_v35 = vpop.f32.mrb[68].mxu1 }
 0x956   : > { %v7916_v62 = vpop.f32.mrb[69].mxu1  ;;  %7946 = vmatprep.mubr.msk.f32.mxu0 %vm910_vm2, %v5004_v35 }
 0x957   : > { %7947 = vmatmul.mubr.msk.f32.gmra.mrb[54].mxu0 %vm910_vm2, %v5083_v51 }
 0x95d   : > { %v5162_v27 = vpop.f32.mrb[70].mxu1 }
 0x95e   : > { %v7930_v52 = vpop.f32.mrb[71].mxu1  ;;  %7949 = vmatprep.mubr.msk.f32.mxu0 %vm910_vm2, %v5162_v27 }
 0x95f   : > { %7950 = vmatmul.mubr.msk.f32.gmra.mrb[56].mxu0 %vm910_vm2, %v5241_v9 }
 0x960   : > { %7970 = vmatprep.mubr.msk.f32.mxu0 %vm8745_vm1, %v8746_v43 }
 0x963   : > { %7971 = vmatmul.mubr.msk.f32.vlgmr.msra.gmra.mrb[72].mxu0 %vm910_vm2, %v5549_v24 }
 0x964   : > { %8289 = vmatpush3.bf16.xpose.msk.msra.mxu0 %vm8945_vm3, %v8287_v38  ;;  %7984 = vmatprep.mubr.msk.f32.mxu0 %vm8745_vm1, %v8746_v43 }
 0x965   : > { %8294 = vmatprep.subr.bf16.mxu0 %v8744_v42 }
 0x968   : > { %v9751_v54 = vpop.f32.mrb[72].mxu1 }
 0x969   : > { %v7958_v44 = vpop.f32.mrb[73].mxu1  ;;  %v6040_v3 = vsel %vm1543_vm4, %v9751_v54, -inf }
 0x96a   : > { %6041 = vmax.xlane.f32.xlu0 %v6040_v3 }
 0x96b   : > { %7985 = vmatmul.mubr.msk.f32.vlgmr.msra.gmra.mrb[74].mxu0 %vm910_vm2, %v5713_v56 }
 0x96c   : > { %8297 = vmatpush3.bf16.xpose.msk.msra.mxu0 %vm8945_vm3, %v8295_v47  ;;  %7998 = vmatprep.mubr.msk.f32.mxu0 %vm8745_vm1, %v8746_v43 }
 0x96d   : > { %8302 = vmatprep.subr.bf16.mxu0 %v8744_v42 }
 0x970   : > { %v5544_v0 = vpop.f32.mrb[74].mxu1 }
 0x971   : > { %v7965_v11 = vpop.f32.mrb[75].mxu1  ;;  %v6043_v49 = vsel %vm1543_vm4, %v5544_v0, -inf }
 0x972   : > { %6044 = vmax.xlane.f32.xlu1 %v6043_v49 }
 0x973   : > { %7999 = vmatmul.mubr.msk.f32.vlgmr.msra.gmra.mrb[76].mxu0 %vm910_vm2, %v5877_v32 }
 0x974   : > { %8012 = vmatprep.mubr.msk.f32.mxu0 %vm8745_vm1, %v8746_v43 }
 0x978   : > { %v5708_v22 = vpop.f32.mrb[76].mxu1 }
 0x979   : > { %v7979_v13 = vpop.f32.mrb[77].mxu1  ;;  %v6049_v58 = vsel %vm1543_vm4, %v5708_v22, -inf }
 0x97a   : > { %6050 = vmax.xlane.f32.xlu0 %v6049_v58 }
 0x980   : > { %v5872_v31 = vpop.f32.mrb[78].mxu1 }
 0x981   : > { %v7993_v25 = vpop.f32.mrb[79].mxu1  ;;  %v6055_v28 = vsel %vm1543_vm4, %v5872_v31, -inf }
 0x982   : > { %6056 = vmax.xlane.f32.xlu1 %v6055_v28 }
 0x988   : > { %v6036_v14 = vpop.f32.mrb[80].mxu1 }
 0x989   : > { %v8007_v60 = vpop.f32.mrb[81].mxu1  ;;  %v6061_v8 = vsel %vm1543_vm4, %v6036_v14, -inf }
 0x98a   : > { %6062 = vmax.xlane.f32.xlu1 %v6061_v8 }
 0x9f7   : > { %v6042_v17 = vpop.xlane.xlu0 %6041 }
 0x9f8   : > { %v6064_v63 = vsub.f32 %v9751_v54, %v6042_v17 }
 0x9fa   : > { %v6072_v62 = vmul.f32 1.442695, %v6064_v63 }
 0x9ff   : > { %v6045_v1 = vpop.xlane.xlu1 %6044 }
 0xa00   : > { %v6065_v37 = vsub.f32 %v5544_v0, %v6045_v1 }
 0xa02   : > { %v6074_v34 = vmul.f32 1.442695, %v6065_v37 }
 0xa04   : > { %8704 = vpow2.f32 %v6074_v34 }
 0xa07   : > { %v6051_v41 = vpop.xlane.xlu0 %6050 }
 0xa08   : > { %v6067_v18 = vsub.f32 %v5708_v22, %v6051_v41 }
 0xa0a   : > { %v6078_v6 = vmul.f32 1.442695, %v6067_v18 }
 0xa0c   : > { %8706 = vpow2.f32 %v6078_v6 }
 0xa0e   : > { %v8705_v5 = vpop.eup %8704 }
 0xa0f   : > { %v6057_v7 = vpop.xlane.xlu1 %6056  ;;  %v6091_v16 = vsel %vm1543_vm4, %v8705_v5, 0.0 }
 0xa10   : > { %v6069_v30 = vsub.f32 %v5872_v31, %v6057_v7  ;;  %6092 = vadd.xlane.f32.xlu1 %v6091_v16 }
 0xa12   : > { %v6082_v48 = vmul.f32 1.442695, %v6069_v30 }
 0xa14   : > { %8708 = vpow2.f32 %v6082_v48 }
 0xa16   : > { %v9769_v40 = vpop.eup %8706 }
 0xa17   : > { %v6063_v20 = vpop.xlane.xlu1 %6062  ;;  %v6097_v23 = vsel %vm1543_vm4, %v9769_v40, 0.0 }
 0xa18   : > { %v6071_v26 = vsub.f32 %v6036_v14, %v6063_v20  ;;  %6098 = vadd.xlane.f32.xlu1 %v6097_v23 }
 0xa1a   : > { %v6086_v2 = vmul.f32 1.442695, %v6071_v26 }
 0xa1c   : > { %8710 = vpow2.f32 %v6086_v2 }
 0xa1d   : > { %8712 = vpow2.f32 %v6072_v62 }
 0xa1e   : > { %v9773_v39 = vpop.eup %8708 }
 0xa1f   : > { %v6103_v61 = vsel %vm1543_vm4, %v9773_v39, 0.0 }
 0xa20   : > { %6104 = vadd.xlane.f32.xlu1 %v6103_v61 }
 0xa26   : > { %v9777_v21 = vpop.eup %8710 }
 0xa27   : > { %v6109_v51 = vsel %vm1543_vm4, %v9777_v21, 0.0  ;;  %v9799_v55 = vpop.eup %8712 }
 0xa28   : > { %6110 = vadd.xlane.f32.xlu1 %v6109_v51  ;;  %v6088_v52 = vsel %vm1543_vm4, %v9799_v55, 0.0 }
 0xa36   : > { %v5626_v9 = vpop.f32.mrb[72].mxu0 }
 0xa37   : > { %v7972_v15 = vpop.f32.mrb[73].mxu0  ;;  %v6046_v35 = vsel %vm1543_vm4, %v5626_v9, -inf }
 0xa38   : > { %6047 = vmax.xlane.f32.xlu0 %v6046_v35 }
 0xa39   : > { %8574 = vrot.lane.b32.xlu1 %v9101_v57, %s8749_s27 }
 0xa3d   : > { %8579 = vrot.lane.b32.xlu1 %v9114_v12, %s8749_s27 }
 0xa3e   : > { %v9787_v10 = vpop.f32.mrb[74].mxu0 }
 0xa3f   : > { %v7986_v24 = vpop.f32.mrb[75].mxu0  ;;  %v6052_v27 = vsel %vm1543_vm4, %v9787_v10, -inf }
 0xa40   : > { %6053 = vmax.xlane.f32.xlu0 %v6052_v27 }
 0xa41   : > { %8584 = vrot.lane.b32.xlu1 %v9125_v19, %s8749_s27 }
 0xa45   : > { %8594 = vrot.lane.b32.xlu1 %v9145_v36, %s8749_s27 }
 0xa46   : > { %v9795_v33 = vpop.f32.mrb[76].mxu0 }
 0xa47   : > { %v8000_v57 = vpop.f32.mrb[77].mxu0  ;;  %v6058_v12 = vsel %vm1543_vm4, %v9795_v33, -inf }
 0xa48   : > { %6059 = vmax.xlane.f32.xlu0 %v6058_v12 }
 0xa49   : > { %8604 = vrot.lane.b32.xlu1 %v9161_v53, %s8749_s27 }
 0xa4c   : > { %6089 = vadd.xlane.f32.xlu0 %v6088_v52 }
 0xa62   : > { %8569 = vrot.lane.b32.xlu0 %v9092_v4, %s8749_s27 }
 0xa66   : > { %8589 = vrot.lane.b32.xlu0 %v9135_v29, %s8749_s27 }
 0xa9d   : > { %v6093_v19 = vpop.xlane.xlu1 %6092 }
 0xa9e   : > { %8714 = vrcp.f32 %v6093_v19 }
 0xaa5   : > { %v6099_v36 = vpop.xlane.xlu1 %6098 }
 0xaa6   : > { %8716 = vrcp.f32 %v6099_v36 }
 0xaa8   : > { %v8715_v53 = vpop.eup %8714 }
 0xaa9   : > { %v6121_v47 = vmul.f32 %v8715_v53, %v8705_v5  ;;  %v7198_v53 = vld [vmem:[%s9888_s8 + $0x18] sm:$0xff] }
 0xaad   : > { %v6105_v38 = vpop.xlane.xlu1 %6104 }
 0xaae   : > { %8718 = vrcp.f32 %v6105_v38 }
 0xab0   : > { %v8717_v0 = vpop.eup %8716 }
 0xab1   : > { %v6123_v31 = vmul.f32 %v8717_v0, %v9769_v40 }
 0xab5   : > { %v6111_v50 = vpop.xlane.xlu1 %6110 }
 0xab6   : > { %8720 = vrcp.f32 %v6111_v50 }
 0xab8   : > { %v8719_v25 = vpop.eup %8718 }
 0xab9   : > { %v8575_v59 = vpop.permute.xlu1 %8574  ;;  %v6125_v37 = vmul.f32 %v8719_v25, %v9773_v39 }
 0xaba   : > { %v8577_v45 = vunpack.i.h.bf16 %v8575_v59  ;;  %v8576_v54 = vunpack.i.l.bf16 %v8575_v59 }
 0xabc   : > { %v8306_v44 = vpack.c.bf16 %v8577_v45, %v8576_v54 }
 0xabd   : > { %v9809_v3 = vpop.permute.xlu1 %8579 }
 0xabe   : > { %8307 = vmatpush3.bf16.msra.mxu1 %v8306_v44  ;;  %v8582_v51 = vunpack.i.h.bf16 %v9809_v3  ;;  %v8581_v63 = vunpack.i.l.bf16 %v9809_v3 }
 0xabf   : > { %8311 = vmatprep.subr.bf16.mxu1 %v8744_v42 }
 0xac0   : > { %v8721_v34 = vpop.eup %8720 }
 0xac1   : > { %v8585_v4 = vpop.permute.xlu1 %8584  ;;  %8020 = vmatmul.mubr.msk.f32.vlgmr.msra.gmra.mrb[82].mxu1 %vm1543_vm4, %v6121_v47  ;;  %v6127_v6 = vmul.f32 %v8721_v34, %v9777_v21 }
 0xac2   : > { %v8587_v29 = vunpack.i.h.bf16 %v8585_v4  ;;  %v8586_v56 = vunpack.i.l.bf16 %v8585_v4  ;;  %8033 = vmatprep.mubr.msk.f32.mxu1 %vm8745_vm1, %v8746_v43 }
 0xac4   : > { %v8312_v11 = vpack.c.bf16 %v8587_v29, %v8586_v56 }
 0xac5   : > { %v6048_v49 = vpop.xlane.xlu0 %6047  ;;  %v8595_v32 = vpop.permute.xlu1 %8594 }
 0xac6   : > { %v6066_v22 = vsub.f32 %v5626_v9, %v6048_v49  ;;  %v8597_v13 = vunpack.i.h.bf16 %v8595_v32  ;;  %v8596_v58 = vunpack.i.l.bf16 %v8595_v32  ;;  %8313 = vmatpush3.bf16.msra.mxu1 %v8312_v11 }
 0xac7   : > { %8317 = vmatprep.subr.bf16.mxu1 %v8744_v42 }
 0xac8   : > { %v6076_v28 = vmul.f32 1.442695, %v6066_v22  ;;  %v8318_v14 = vpack.c.bf16 %v8597_v13, %v8596_v58 }
 0xac9   : > { %v8605_v60 = vpop.permute.xlu1 %8604  ;;  %8034 = vmatmul.mubr.msk.f32.vlgmr.msra.gmra.mrb[84].mxu1 %vm1543_vm4, %v6123_v31 }
 0xaca   : > { %8722 = vpow2.f32 %v6076_v28  ;;  %v8607_v8 = vunpack.i.h.bf16 %v8605_v60  ;;  %v8606_v1 = vunpack.i.l.bf16 %v8605_v60  ;;  %8319 = vmatpush3.bf16.msra.mxu1 %v8318_v14  ;;  %8047 = vmatprep.mubr.msk.f32.mxu1 %vm8745_vm1, %v8746_v43  ;;  %v7207_v14 = vld [vmem:[%s9889_s9] ss:$0 sm:$0xff] }
 0xacb   : > { %8323 = vmatprep.subr.bf16.mxu1 %v8744_v42 }
 0xacc   : > { %v8324_v17 = vpack.c.bf16 %v8607_v8, %v8606_v1 }
 0xacd   : > { %v6054_v41 = vpop.xlane.xlu0 %6053  ;;  %8048 = vmatmul.mubr.msk.f32.vlgmr.msra.gmra.mrb[86].mxu1 %vm1543_vm4, %v6125_v37 }
 0xace   : > { %v6068_v18 = vsub.f32 %v9787_v10, %v6054_v41  ;;  %8325 = vmatpush3.bf16.msra.mxu1 %v8324_v17  ;;  %8061 = vmatprep.mubr.msk.f32.mxu1 %vm8745_vm1, %v8746_v43  ;;  %v8309_v10 = vpack.c.bf16 %v8582_v51, %v8581_v63 }
 0xad0   : > { %v6080_v5 = vmul.f32 1.442695, %v6068_v18 }
 0xad1   : > { %8062 = vmatmul.mubr.msk.f32.vlgmr.msra.gmra.mrb[88].mxu1 %vm1543_vm4, %v6127_v6 }
 0xad2   : > { %8724 = vpow2.f32 %v6080_v5 }
 0xad4   : > { %v8723_v7 = vpop.eup %8722 }
 0xad5   : > { %v6060_v16 = vpop.xlane.xlu0 %6059  ;;  %v6094_v30 = vsel %vm1543_vm4, %v8723_v7, 0.0 }
 0xad6   : > { %v6070_v48 = vsub.f32 %v9795_v33, %v6060_v16  ;;  %6095 = vadd.xlane.f32.xlu0 %v6094_v30 }
 0xad8   : > { %v6084_v40 = vmul.f32 1.442695, %v6070_v48 }
 0xad9   : > { %v6090_v20 = vpop.xlane.xlu0 %6089 }
 0xada   : > { %8726 = vpow2.f32 %v6084_v40 }
 0xadb   : > { %8728 = vrcp.f32 %v6090_v20 }
 0xadc   : > { %v8725_v23 = vpop.eup %8724 }
 0xadd   : > { %v8570_v26 = vpop.permute.xlu0 %8569  ;;  %v6100_v2 = vsel %vm1543_vm4, %v8725_v23, 0.0 }
 0xade   : > { %v8572_v39 = vunpack.i.h.bf16 %v8570_v26  ;;  %v8571_v61 = vunpack.i.l.bf16 %v8570_v26  ;;  %6101 = vadd.xlane.f32.xlu0 %v6100_v2 }
 0xae0   : > { %v8303_v21 = vpack.c.bf16 %v8572_v39, %v8571_v61 }
 0xae1   : > { %v8590_v24 = vpop.permute.xlu0 %8589 }
 0xae2   : > { %8304 = vmatpush3.bf16.msra.mxu0 %v8303_v21  ;;  %v8592_v57 = vunpack.i.h.bf16 %v8590_v24  ;;  %v8591_v12 = vunpack.i.l.bf16 %v8590_v24 }
 0xae3   : > { %8308 = vmatprep.subr.bf16.mxu0 %v8744_v42 }
 0xae4   : > { %v8727_v9 = vpop.eup %8726  ;;  %v8315_v19 = vpack.c.bf16 %v8592_v57, %v8591_v12 }
 0xae5   : > { %v8729_v15 = vpop.eup %8728  ;;  %v6106_v35 = vsel %vm1543_vm4, %v8727_v9, 0.0 }
 0xae6   : > { %v6120_v62 = vmul.f32 %v8729_v15, %v9799_v55  ;;  %6107 = vadd.xlane.f32.xlu0 %v6106_v35 }
 0xae8   : > { %8013 = vmatmul.mubr.msk.f32.vlgmr.msra.gmra.mrb[78].mxu0 %vm1543_vm4, %v6120_v62 }
 0xae9   : > { %8310 = vmatpush3.bf16.msra.mxu0 %v8309_v10  ;;  %8026 = vmatprep.mubr.msk.f32.mxu0 %vm8745_vm1, %v8746_v43 }
 0xaea   : > { %8314 = vmatprep.subr.bf16.mxu0 %v8744_v42 }
 0xafc   : > { %8599 = vrot.lane.b32.xlu0 %v9155_v46, %s8749_s27 }
 0xb63   : > { %v6096_v27 = vpop.xlane.xlu0 %6095 }
 0xb64   : > { %8730 = vrcp.f32 %v6096_v27 }
 0xb6b   : > { %v6102_v33 = vpop.xlane.xlu0 %6101 }
 0xb6c   : > { %8732 = vrcp.f32 %v6102_v33 }
 0xb6e   : > { %v8731_v55 = vpop.eup %8730 }
 0xb6f   : > { %v6122_v52 = vmul.f32 %v8731_v55, %v8723_v7 }
 0xb71   : > { %8027 = vmatmul.mubr.msk.f32.vlgmr.msra.gmra.mrb[80].mxu0 %vm1543_vm4, %v6122_v52 }
 0xb72   : > { %8316 = vmatpush3.bf16.msra.mxu0 %v8315_v19  ;;  %8040 = vmatprep.mubr.msk.f32.mxu0 %vm8745_vm1, %v8746_v43 }
 0xb73   : > { %v6108_v36 = vpop.xlane.xlu0 %6107  ;;  %8320 = vmatprep.subr.bf16.mxu0 %v8744_v42 }
 0xb74   : > { %8734 = vrcp.f32 %v6108_v36 }
 0xb76   : > { %v8733_v46 = vpop.eup %8732 }
 0xb77   : > { %v6124_v38 = vmul.f32 %v8733_v46, %v8725_v23  ;;  %v8600_v50 = vpop.permute.xlu0 %8599 }
 0xb78   : > { %v8602_v59 = vunpack.i.h.bf16 %v8600_v50  ;;  %v8601_v45 = vunpack.i.l.bf16 %v8600_v50 }
 0xb79   : > { %8041 = vmatmul.mubr.msk.f32.vlgmr.msra.gmra.mrb[82].mxu0 %vm1543_vm4, %v6124_v38 }
 0xb7a   : > { %v8321_v54 = vpack.c.bf16 %v8602_v59, %v8601_v45  ;;  %8054 = vmatprep.mubr.msk.f32.mxu0 %vm8745_vm1, %v8746_v43 }
 0xb7c   : > { %8322 = vmatpush3.bf16.msra.mxu0 %v8321_v54 }
 0xb7d   : > { %8064 = vmatprep.subr.mxu0 %v7198_v53 }
 0xb7e   : > { %v8735_v44 = vpop.eup %8734 }
 0xb7f   : > { %v6126_v42 = vmul.f32 %v8735_v44, %v8727_v9 }
 0xb81   : > { %8055 = vmatmul.mubr.msk.f32.vlgmr.msra.gmra.mrb[84].mxu0 %vm1543_vm4, %v6126_v42 }
 0xb82   : > { %8065 = vmatpush3.msra.mxu0 %v7198_v53 }
 0xb94   : > { %v6282_v3 = vpop.f32.mrb[82].mxu1 }
 0xb95   : > { %v8021_v47 = vpop.f32.mrb[83].mxu1 }
 0xb9c   : > { %v6440_v4 = vpop.f32.mrb[84].mxu1 }
 0xb9d   : > { %v8035_v29 = vpop.f32.mrb[85].mxu1 }
 0xba0   : > { %v6598_v56 = vpop.f32.mrb[86].mxu1 }
 0xba1   : > { %v8049_v0 = vpop.f32.mrb[87].mxu1 }
 0xba4   : > { %v6756_v11 = vpop.f32.mrb[88].mxu1 }
 0xba5   : > { %v8063_v49 = vpop.f32.mrb[89].mxu1 }
 0xbbb   : > { %v6203_v43 = vpop.f32.mrb[78].mxu0 }
 0xbbc   : > { %v8014_v32 = vpop.f32.mrb[79].mxu0  ;;  %8066 = vmatprep.mubr.msk.f32.mxu0 %vm910_vm2, %v6203_v43 }
 0xbbd   : > { %8067 = vmatmul.mubr.msk.f32.vlgmr.msra.gmra.mrb[50].mxu0 %vm910_vm2, %v6282_v3 }
 0xc44   : > { %v6361_v22 = vpop.f32.mrb[80].mxu0 }
 0xc45   : > { %v8028_v13 = vpop.f32.mrb[81].mxu0  ;;  %8069 = vmatprep.mubr.msk.f32.mxu0 %vm910_vm2, %v6361_v22 }
 0xc46   : > { %8070 = vmatmul.mubr.msk.f32.gmra.mrb[52].mxu0 %vm910_vm2, %v6440_v4 }
 0xc4c   : > { %v6519_v58 = vpop.f32.mrb[82].mxu0 }
 0xc4d   : > { %v8042_v31 = vpop.f32.mrb[83].mxu0  ;;  %8072 = vmatprep.mubr.msk.f32.mxu0 %vm910_vm2, %v6519_v58 }
 0xc4e   : > { %8073 = vmatmul.mubr.msk.f32.gmra.mrb[54].mxu0 %vm910_vm2, %v6598_v56 }
 0xc54   : > { %v6677_v25 = vpop.f32.mrb[84].mxu0 }
 0xc55   : > { %v8056_v28 = vpop.f32.mrb[85].mxu0  ;;  %8075 = vmatprep.mubr.msk.f32.mxu0 %vm910_vm2, %v6677_v25 }
 0xc56   : > { %8076 = vmatmul.mubr.msk.f32.gmra.mrb[56].mxu0 %vm910_vm2, %v6756_v11 }
 0xc90   : > { %v8068_v60 = vpop.f32.mrb[50].mxu0 }
 0xc91   : > { %v6907_v8 = vadd.f32 %v8068_v60, %v7207_v14  ;;  %v6852_v1 = vpop.f32.mrb[51].mxu0 }
 0xc92   : > { %v6906_v37 = vadd.f32 %v7207_v14, %v6852_v1 }
 0xc93   : > { %6915 = vst.msk [vmem:[%s383_s17 + $0x8] sm:$0xff] %vm420_vm0, %v6907_v8 }
 0xc94   : > { %6914 = vst.msk [vmem:[%s383_s17] sm:$0xff] %vm420_vm0, %v6906_v37 }
 0xd19   : > { %v8071_v34 = vpop.f32.mrb[52].mxu0 }
 0xd1a   : > { %v6909_v17 = vadd.f32 %v8071_v34, %v7207_v14  ;;  %v6862_v41 = vpop.f32.mrb[53].mxu0 }
 0xd1b   : > { %v6908_v18 = vadd.f32 %v7207_v14, %v6862_v41 }
 0xd1c   : > { %6917 = vst.msk [vmem:[%s383_s17 + $0x18] sm:$0xff] %vm420_vm0, %v6909_v17 }
 0xd1d   : > { %6916 = vst.msk [vmem:[%s383_s17 + $0x10] sm:$0xff] %vm420_vm0, %v6908_v18 }
 0xd21   : > { %v8074_v6 = vpop.f32.mrb[54].mxu0 }
 0xd22   : > { %v6911_v5 = vadd.f32 %v8074_v6, %v7207_v14  ;;  %v6872_v7 = vpop.f32.mrb[55].mxu0 }
 0xd23   : > { %v6910_v16 = vadd.f32 %v7207_v14, %v6872_v7 }
 0xd24   : > { %6919 = vst.msk [vmem:[%s383_s17 + $0x28] sm:$0xff] %vm420_vm0, %v6911_v5 }
 0xd25   : > { %6918 = vst.msk [vmem:[%s383_s17 + $0x20] sm:$0xff] %vm420_vm0, %v6910_v16 }
 0xd29   : > { %v8077_v30 = vpop.f32.mrb[56].mxu0 }
 0xd2a   : > { %v6913_v48 = vadd.f32 %v8077_v30, %v7207_v14  ;;  %v6882_v40 = vpop.f32.mrb[57].mxu0 }
 0xd2b   : > { %v6912_v20 = vadd.f32 %v7207_v14, %v6882_v40 }
 0xd2c   : > { %6921 = vst.msk [vmem:[%s383_s17 + $0x38] sm:$0xff] %vm420_vm0, %v6913_v48 }
 0xd2d   : > { %6920 = vst.msk [vmem:[%s383_s17 + $0x30] sm:$0xff] %vm420_vm0, %v6912_v20 }
 0xd2e PF: > { %s20_s13 = sadd.s32 1, %s8742_s13  }
 0xd2f   : > { %p17_p5 = scmp.ge.s32.totalorder %s20_s13, 4  }
 0xd31   :  { %19 = sbr.rel (!%p17_p5) target bundleno = 1 (0x1), region = 96 }

</bundles_post_ra>
